<compile_context>
chip_gen: v6e
topology: v6e:2x2x1
jax: 0.10.0
libtpu: 0.0.40
codegen_flags: <defaults>
</compile_context>

<pallas_src>
import functools

import jax
import jax.numpy as jnp
from jax.experimental import pallas as pl
from jax.experimental.pallas import tpu as pltpu

LANE = 128


def _round_up(n, m):
    return ((n + m - 1) // m) * m


def _pad2(a, rows, cols):
    return jnp.pad(a, ((0, rows - a.shape[0]), (0, cols - a.shape[1])))


def vae_kernel(x_ref, w1_ref, b1_ref, whead_ref, bhead_ref,
               wd1_ref, bd1_ref, wd2_ref, bd2_ref, e_ref,
               mu_ref, lv_ref, z_ref, h_ref, xh_ref, *, zp):
    # ---- Encoder hidden: relu(x @ W1 + b1), fp32 MXU accumulation ----
    h_enc = jnp.dot(x_ref[...], w1_ref[...],
                    preferred_element_type=jnp.float32) + b1_ref[...]
    h_enc = jnp.maximum(h_enc, 0.0)

    # ---- Fused mu|logvar head: one [Bt,hp] x [hp,2*zp] matmul ----
    head = jnp.dot(h_enc.astype(whead_ref.dtype), whead_ref[...],
                   preferred_element_type=jnp.float32) + bhead_ref[...]
    mu = head[:, :zp]          # 128-aligned static slices -> full vregs, no masking
    logvar = head[:, zp:]

    # ---- reparameterize (mode=True): z = e * exp(0.5*logvar) + mu ----
    # fp32 elementwise; e ~ U[0,1) per torch.rand_like in the reference.
    z = e_ref[...] * jnp.exp(0.5 * logvar) + mu

    # ---- Decoder ----
    h = jnp.dot(z.astype(wd1_ref.dtype), wd1_ref[...],
                preferred_element_type=jnp.float32) + bd1_ref[...]
    h = jnp.maximum(h, 0.0)
    xh = jax.nn.sigmoid(
        jnp.dot(h.astype(wd2_ref.dtype), wd2_ref[...],
                preferred_element_type=jnp.float32) + bd2_ref[...])

    # Lane-dense (multiple-of-128 wide) stores; padding removed inside the jit.
    mu_ref[...] = mu
    lv_ref[...] = logvar
    z_ref[...] = z
    h_ref[...] = h
    xh_ref[...] = xh


def pack_params(params, compute_dtype=jnp.float32):
    """Pad weights/biases to 128-lane multiples and fuse the mu/logvar head."""
    x_dim, h_dim = params["w1"].shape
    z_dim = params["wmu"].shape[1]
    xp = _round_up(x_dim, LANE)
    hp = _round_up(h_dim, LANE)
    zp = _round_up(z_dim, LANE)

    w1 = _pad2(params["w1"], xp, hp).astype(compute_dtype)
    b1 = _pad2(params["b1"], 1, hp).astype(jnp.float32)

    # Fused head: mu columns at [0:zp), logvar columns at [zp:2*zp).
    whead = jnp.zeros((hp, 2 * zp), jnp.float32)
    whead = whead.at[:h_dim, :z_dim].set(params["wmu"])
    whead = whead.at[:h_dim, zp:zp + z_dim].set(params["wlv"])
    whead = whead.astype(compute_dtype)
    bhead = jnp.zeros((1, 2 * zp), jnp.float32)
    bhead = bhead.at[:, :z_dim].set(params["bmu"])
    bhead = bhead.at[:, zp:zp + z_dim].set(params["blv"])

    wd1 = _pad2(params["wd1"], zp, xp).astype(compute_dtype)
    bd1 = _pad2(params["bd1"], 1, xp).astype(jnp.float32)
    wd2 = _pad2(params["wd2"], xp, xp).astype(compute_dtype)
    bd2 = _pad2(params["bd2"], 1, xp).astype(jnp.float32)

    packed = dict(w1=w1, b1=b1, whead=whead, bhead=bhead,
                  wd1=wd1, bd1=bd1, wd2=wd2, bd2=bd2)
    dims = dict(x_dim=x_dim, h_dim=h_dim, z_dim=z_dim, xp=xp, hp=hp, zp=zp)
    return packed, dims


def make_vae_forward(params, *, compute_dtype=jnp.float32, block_b=512,
                     single_buffer_weights=False):
    """Pack/pad the weights ONCE; return a jitted forward(x, e) -> (mu,logvar,z,h,xh).

    compute_dtype controls the matmul-operand dtype (bf16 is the MXU-native fast
    path on v5e/v6e/v7x); accumulation and elementwise math stay fp32.
    """
    packed, d = pack_params(params, compute_dtype)
    x_dim, z_dim = d["x_dim"], d["z_dim"]
    xp, hp, zp = d["xp"], d["hp"], d["zp"]

    # bf16 packs 16 rows per vreg -> align batch tile to dtype packing.
    row_align = 16 if jnp.dtype(compute_dtype) == jnp.dtype(jnp.bfloat16) else 8

    weight_names = ("w1", "b1", "whead", "bhead", "wd1", "bd1", "wd2", "bd2")
    weights = tuple(packed[n] for n in weight_names)
    weight_bytes = sum(int(w.size) * w.dtype.itemsize for w in weights)
    elem = jnp.dtype(compute_dtype).itemsize

    def resident_spec(arr):
        # Whole array, same block every grid step -> stays resident in VMEM.
        if single_buffer_weights:
            # Block index never changes -> double-buffering is pure VMEM waste.
            # Only needed once weights grow to realistic VAE sizes (v7x 64 MiB VMEM).
            return pl.BlockSpec(arr.shape, lambda i: (0, 0),
                                pipeline_mode=pl.Buffered(1))
        return pl.BlockSpec(arr.shape, lambda i: (0, 0))

    @jax.jit
    def forward(x, e):
        B = x.shape[0]
        bt = min(block_b, _round_up(B, row_align))   # batch tile
        bp = _round_up(B, bt)                        # padded batch
        grid = (bp // bt,)

        # Pads fuse into this jit (no standalone host/HBM copy per call).
        x_p = _pad2(x, bp, xp).astype(compute_dtype)
        e_p = _pad2(e, bp, zp).astype(jnp.float32)

        def batch_spec(cols):
            return pl.BlockSpec((bt, cols), lambda i: (i, 0))

        in_specs = ([batch_spec(xp)]
                    + [resident_spec(w) for w in weights]
                    + [batch_spec(zp)])
        out_shapes = (
            jax.ShapeDtypeStruct((bp, zp), jnp.float32),   # mu   (padded)
            jax.ShapeDtypeStruct((bp, zp), jnp.float32),   # logvar
            jax.ShapeDtypeStruct((bp, zp), jnp.float32),   # z
            jax.ShapeDtypeStruct((bp, xp), jnp.float32),   # h
            jax.ShapeDtypeStruct((bp, xp), jnp.float32),   # xh
        )
        out_specs = (batch_spec(zp), batch_spec(zp), batch_spec(zp),
                     batch_spec(xp), batch_spec(xp))

        cost = pl.CostEstimate(
            flops=2 * bp * (xp * hp + hp * 2 * zp + zp * xp + xp * xp),
            transcendentals=bp * (zp + xp),                     # exp + sigmoid
            bytes_accessed=(bp * xp * elem + bp * zp * 4 + weight_bytes
                            + (3 * bp * zp + 2 * bp * xp) * 4))

        mu_p, lv_p, z_p, h_p, xh_p = pl.pallas_call(
            functools.partial(vae_kernel, zp=zp),
            grid=grid,
            in_specs=in_specs,
            out_specs=out_specs,
            out_shape=out_shapes,
            compiler_params=pltpu.CompilerParams(
                dimension_semantics=("parallel",)),
            cost_estimate=cost,
        )(x_p, *weights, e_p)

        # Un-pad inside the jit so the slices fuse with the custom call's consumers;
        # row slices are no-ops whenever B is already tile-aligned.
        return (mu_p[:B, :z_dim], lv_p[:B, :z_dim], z_p[:B, :z_dim],
                h_p[:B, :x_dim], xh_p[:B, :x_dim])

    return forward


def init_params(key, x_dim, h_dim, z_dim):
    ks = jax.random.split(key, 10)

    def lin(k, fan_in, fan_out):
        scale = 1.0 / jnp.sqrt(fan_in)
        return jax.random.uniform(k, (fan_in, fan_out), jnp.float32, -scale, scale)

    def bias(k, fan_in, fan_out):
        scale = 1.0 / jnp.sqrt(fan_in)
        return jax.random.uniform(k, (1, fan_out), jnp.float32, -scale, scale)

    return {
        "w1":  lin(ks[0], x_dim, h_dim), "b1":  bias(ks[5], x_dim, h_dim),
        "wmu": lin(ks[1], h_dim, z_dim), "bmu": bias(ks[6], h_dim, z_dim),
        "wlv": lin(ks[2], h_dim, z_dim), "blv": bias(ks[7], h_dim, z_dim),
        "wd1": lin(ks[3], z_dim, x_dim), "bd1": bias(ks[8], z_dim, x_dim),
        "wd2": lin(ks[4], x_dim, x_dim), "bd2": bias(ks[9], x_dim, x_dim),
    }


if __name__ == "__main__":
    # Small feature dims per the module spec; a 256-row batch -> single 256-row
    # grid step (bt=B), which keeps the MXU pipeline full and avoids a 1-step-per-
    # core un-pipelined grid on v7x.
    B, x_dim, h_dim, z_dim = 256, 32, 32, 16

    key = jax.random.PRNGKey(0)
    k_x, k_p, k_e = jax.random.split(key, 3)

    x = jax.random.uniform(k_x, (B, x_dim), jnp.float32)   # "image" input in [0,1)
    params = init_params(k_p, x_dim, h_dim, z_dim)
    e = jax.random.uniform(k_e, (B, z_dim), jnp.float32)   # torch.rand_like -> U[0,1)

    # ---- fp32 path: exact semantics of the PyTorch module ----
    fwd_f32 = make_vae_forward(params, compute_dtype=jnp.float32, block_b=512)
    outs = fwd_f32(x, e)
    jax.block_until_ready(outs)
    mu, logvar, z, h, xh = outs

    # Pure-JAX reference.
    h_enc = jnp.maximum(x @ params["w1"] + params["b1"], 0.0)
    mu_r = h_enc @ params["wmu"] + params["bmu"]
    lv_r = h_enc @ params["wlv"] + params["blv"]
    z_r = e * jnp.exp(0.5 * lv_r) + mu_r
    h_r = jnp.maximum(z_r @ params["wd1"] + params["bd1"], 0.0)
    xh_r = jax.nn.sigmoid(h_r @ params["wd2"] + params["bd2"])
    refs = (mu_r, lv_r, z_r, h_r, xh_r)

    for got, ref in zip((mu, logvar, z, h, xh), refs):
        assert got.shape == ref.shape, "shape mismatch vs reference"
        assert jnp.allclose(got, ref, atol=1e-4, rtol=1e-4), "fp32 mismatch vs reference"

    # ---- bf16 matmul-operand fast path (all TPU generations), fp32 accumulation ----
    fwd_bf16 = make_vae_forward(params, compute_dtype=jnp.bfloat16, block_b=512)
    outs_bf16 = fwd_bf16(x, e)
    jax.block_until_ready(outs_bf16)
    for got, ref in zip(outs_bf16, refs):
        assert jnp.allclose(got, ref, atol=1e-1, rtol=1e-1), "bf16 path diverged"

    print("KERNEL_OK")
</pallas_src>

<mosaic_0001>
module attributes {stable_mosaic.version = 11 : i64} {
  func.func @vae_kernel(%arg0: i32, %arg1: memref<256x128xf32, #tpu.memory_space<vmem>>, %arg2: memref<128x128xf32, #tpu.memory_space<vmem>>, %arg3: memref<1x128xf32, #tpu.memory_space<vmem>>, %arg4: memref<128x256xf32, #tpu.memory_space<vmem>>, %arg5: memref<1x256xf32, #tpu.memory_space<vmem>>, %arg6: memref<128x128xf32, #tpu.memory_space<vmem>>, %arg7: memref<1x128xf32, #tpu.memory_space<vmem>>, %arg8: memref<128x128xf32, #tpu.memory_space<vmem>>, %arg9: memref<1x128xf32, #tpu.memory_space<vmem>>, %arg10: memref<256x128xf32, #tpu.memory_space<vmem>>, %arg11: memref<256x128xf32, #tpu.memory_space<vmem>>, %arg12: memref<256x128xf32, #tpu.memory_space<vmem>>, %arg13: memref<256x128xf32, #tpu.memory_space<vmem>>, %arg14: memref<256x128xf32, #tpu.memory_space<vmem>>, %arg15: memref<256x128xf32, #tpu.memory_space<vmem>>) attributes {dimension_semantics = [#tpu.dimension_semantics<parallel>], iteration_bounds = array<i64: 1>, scalar_prefetch = 0 : i64, scratch_operands = 0 : i64, tpu.core_type = #tpu.core_type<tc>, window_params = [{transform_indices = @transform_0, window_bounds = array<i64: 256, 128>}, {pipeline_mode = #tpu.pipeline_mode<synchronous>, transform_indices = @transform_1, window_bounds = array<i64: 128, 128>}, {pipeline_mode = #tpu.pipeline_mode<synchronous>, transform_indices = @transform_2, window_bounds = array<i64: 1, 128>}, {pipeline_mode = #tpu.pipeline_mode<synchronous>, transform_indices = @transform_3, window_bounds = array<i64: 128, 256>}, {pipeline_mode = #tpu.pipeline_mode<synchronous>, transform_indices = @transform_4, window_bounds = array<i64: 1, 256>}, {pipeline_mode = #tpu.pipeline_mode<synchronous>, transform_indices = @transform_5, window_bounds = array<i64: 128, 128>}, {pipeline_mode = #tpu.pipeline_mode<synchronous>, transform_indices = @transform_6, window_bounds = array<i64: 1, 128>}, {pipeline_mode = #tpu.pipeline_mode<synchronous>, transform_indices = @transform_7, window_bounds = array<i64: 128, 128>}, {pipeline_mode = #tpu.pipeline_mode<synchronous>, transform_indices = @transform_8, window_bounds = array<i64: 1, 128>}, {transform_indices = @transform_9, window_bounds = array<i64: 256, 128>}, {transform_indices = @transform_10, window_bounds = array<i64: 256, 128>}, {transform_indices = @transform_11, window_bounds = array<i64: 256, 128>}, {transform_indices = @transform_12, window_bounds = array<i64: 256, 128>}, {transform_indices = @transform_13, window_bounds = array<i64: 256, 128>}, {transform_indices = @transform_14, window_bounds = array<i64: 256, 128>}]} {
    %c0 = arith.constant 0 : index
    %c0_0 = arith.constant 0 : index
    %0 = vector.load %arg1[%c0, %c0_0] : memref<256x128xf32, #tpu.memory_space<vmem>>, vector<256x128xf32>
    %c0_1 = arith.constant 0 : index
    %c0_2 = arith.constant 0 : index
    %1 = vector.load %arg2[%c0_1, %c0_2] : memref<128x128xf32, #tpu.memory_space<vmem>>, vector<128x128xf32>
    %cst = arith.constant dense<0.000000e+00> : vector<256x128xf32>
    %2 = tpu.matmul %0, %1, %cst {dimension_numbers = #tpu.dot_dimension_numbers<[1], [0], [0], [1], [0, 0, 1, 1], [], []>} : vector<256x128xf32>, vector<128x128xf32>, vector<256x128xf32> -> vector<256x128xf32>
    %c0_3 = arith.constant 0 : index
    %c0_4 = arith.constant 0 : index
    %3 = vector.load %arg3[%c0_3, %c0_4] : memref<1x128xf32, #tpu.memory_space<vmem>>, vector<1x128xf32>
    %4 = vector.broadcast %3 : vector<1x128xf32> to vector<256x128xf32>
    %5 = arith.addf %2, %4 : vector<256x128xf32>
    %cst_5 = arith.constant 0.000000e+00 : f32
    %6 = vector.broadcast %cst_5 : f32 to vector<256x128xf32>
    %7 = arith.maximumf %5, %6 : vector<256x128xf32>
    %c0_6 = arith.constant 0 : index
    %c0_7 = arith.constant 0 : index
    %8 = vector.load %arg4[%c0_6, %c0_7] : memref<128x256xf32, #tpu.memory_space<vmem>>, vector<128x256xf32>
    %cst_8 = arith.constant dense<0.000000e+00> : vector<256x256xf32>
    %9 = tpu.matmul %7, %8, %cst_8 {dimension_numbers = #tpu.dot_dimension_numbers<[1], [0], [0], [1], [0, 0, 1, 1], [], []>} : vector<256x128xf32>, vector<128x256xf32>, vector<256x256xf32> -> vector<256x256xf32>
    %c0_9 = arith.constant 0 : index
    %c0_10 = arith.constant 0 : index
    %10 = vector.load %arg5[%c0_9, %c0_10] : memref<1x256xf32, #tpu.memory_space<vmem>>, vector<1x256xf32>
    %11 = vector.broadcast %10 : vector<1x256xf32> to vector<256x256xf32>
    %12 = arith.addf %9, %11 : vector<256x256xf32>
    %13 = vector.extract_strided_slice %12 {offsets = [0, 0], sizes = [256, 128], strides = [1, 1]} : vector<256x256xf32> to vector<256x128xf32>
    %14 = vector.extract_strided_slice %12 {offsets = [0, 128], sizes = [256, 128], strides = [1, 1]} : vector<256x256xf32> to vector<256x128xf32>
    %c0_11 = arith.constant 0 : index
    %c0_12 = arith.constant 0 : index
    %15 = vector.load %arg10[%c0_11, %c0_12] : memref<256x128xf32, #tpu.memory_space<vmem>>, vector<256x128xf32>
    %cst_13 = arith.constant 5.000000e-01 : f32
    %16 = vector.broadcast %cst_13 : f32 to vector<256x128xf32>
    %17 = arith.mulf %16, %14 : vector<256x128xf32>
    %18 = math.exp %17 : vector<256x128xf32>
    %19 = arith.mulf %15, %18 : vector<256x128xf32>
    %20 = arith.addf %19, %13 : vector<256x128xf32>
    %c0_14 = arith.constant 0 : index
    %c0_15 = arith.constant 0 : index
    %21 = vector.load %arg6[%c0_14, %c0_15] : memref<128x128xf32, #tpu.memory_space<vmem>>, vector<128x128xf32>
    %cst_16 = arith.constant dense<0.000000e+00> : vector<256x128xf32>
    %22 = tpu.matmul %20, %21, %cst_16 {dimension_numbers = #tpu.dot_dimension_numbers<[1], [0], [0], [1], [0, 0, 1, 1], [], []>} : vector<256x128xf32>, vector<128x128xf32>, vector<256x128xf32> -> vector<256x128xf32>
    %c0_17 = arith.constant 0 : index
    %c0_18 = arith.constant 0 : index
    %23 = vector.load %arg7[%c0_17, %c0_18] : memref<1x128xf32, #tpu.memory_space<vmem>>, vector<1x128xf32>
    %24 = vector.broadcast %23 : vector<1x128xf32> to vector<256x128xf32>
    %25 = arith.addf %22, %24 : vector<256x128xf32>
    %cst_19 = arith.constant 0.000000e+00 : f32
    %26 = vector.broadcast %cst_19 : f32 to vector<256x128xf32>
    %27 = arith.maximumf %25, %26 : vector<256x128xf32>
    %c0_20 = arith.constant 0 : index
    %c0_21 = arith.constant 0 : index
    %28 = vector.load %arg8[%c0_20, %c0_21] : memref<128x128xf32, #tpu.memory_space<vmem>>, vector<128x128xf32>
    %cst_22 = arith.constant dense<0.000000e+00> : vector<256x128xf32>
    %29 = tpu.matmul %27, %28, %cst_22 {dimension_numbers = #tpu.dot_dimension_numbers<[1], [0], [0], [1], [0, 0, 1, 1], [], []>} : vector<256x128xf32>, vector<128x128xf32>, vector<256x128xf32> -> vector<256x128xf32>
    %c0_23 = arith.constant 0 : index
    %c0_24 = arith.constant 0 : index
    %30 = vector.load %arg9[%c0_23, %c0_24] : memref<1x128xf32, #tpu.memory_space<vmem>>, vector<1x128xf32>
    %31 = vector.broadcast %30 : vector<1x128xf32> to vector<256x128xf32>
    %32 = arith.addf %29, %31 : vector<256x128xf32>
    %33 = arith.negf %32 : vector<256x128xf32>
    %34 = math.exp %33 : vector<256x128xf32>
    %cst_25 = arith.constant 1.000000e+00 : f32
    %35 = vector.broadcast %cst_25 : f32 to vector<256x128xf32>
    %36 = arith.addf %35, %34 : vector<256x128xf32>
    %37 = arith.divf %35, %36 : vector<256x128xf32>
    %c0_26 = arith.constant 0 : index
    %c0_27 = arith.constant 0 : index
    %38 = vector.load %arg11[%c0_26, %c0_27] : memref<256x128xf32, #tpu.memory_space<vmem>>, vector<256x128xf32>
    tpu.vector_store %arg11[%c0_26, %c0_27], %13 {strides = array<i32>} : memref<256x128xf32, #tpu.memory_space<vmem>>, vector<256x128xf32>,
    %c0_28 = arith.constant 0 : index
    %c0_29 = arith.constant 0 : index
    %39 = vector.load %arg12[%c0_28, %c0_29] : memref<256x128xf32, #tpu.memory_space<vmem>>, vector<256x128xf32>
    tpu.vector_store %arg12[%c0_28, %c0_29], %14 {strides = array<i32>} : memref<256x128xf32, #tpu.memory_space<vmem>>, vector<256x128xf32>,
    %c0_30 = arith.constant 0 : index
    %c0_31 = arith.constant 0 : index
    %40 = vector.load %arg13[%c0_30, %c0_31] : memref<256x128xf32, #tpu.memory_space<vmem>>, vector<256x128xf32>
    tpu.vector_store %arg13[%c0_30, %c0_31], %20 {strides = array<i32>} : memref<256x128xf32, #tpu.memory_space<vmem>>, vector<256x128xf32>,
    %c0_32 = arith.constant 0 : index
    %c0_33 = arith.constant 0 : index
    %41 = vector.load %arg14[%c0_32, %c0_33] : memref<256x128xf32, #tpu.memory_space<vmem>>, vector<256x128xf32>
    tpu.vector_store %arg14[%c0_32, %c0_33], %27 {strides = array<i32>} : memref<256x128xf32, #tpu.memory_space<vmem>>, vector<256x128xf32>,
    %c0_34 = arith.constant 0 : index
    %c0_35 = arith.constant 0 : index
    %42 = vector.load %arg15[%c0_34, %c0_35] : memref<256x128xf32, #tpu.memory_space<vmem>>, vector<256x128xf32>
    tpu.vector_store %arg15[%c0_34, %c0_35], %37 {strides = array<i32>} : memref<256x128xf32, #tpu.memory_space<vmem>>, vector<256x128xf32>,
    return
  }
  func.func @transform_0(%arg0: i32) -> (i32, i32) {
    %c0_i32 = arith.constant 0 : i32
    %c0_i32_0 = arith.constant 0 : i32
    return %arg0, %c0_i32 : i32, i32
  }
  func.func @transform_1(%arg0: i32) -> (i32, i32) {
    %c0_i32 = arith.constant 0 : i32
    %c0_i32_0 = arith.constant 0 : i32
    %c0_i32_1 = arith.constant 0 : i32
    return %c0_i32, %c0_i32_0 : i32, i32
  }
  func.func @transform_2(%arg0: i32) -> (i32, i32) {
    %c0_i32 = arith.constant 0 : i32
    %c0_i32_0 = arith.constant 0 : i32
    %c0_i32_1 = arith.constant 0 : i32
    return %c0_i32, %c0_i32_0 : i32, i32
  }
  func.func @transform_3(%arg0: i32) -> (i32, i32) {
    %c0_i32 = arith.constant 0 : i32
    %c0_i32_0 = arith.constant 0 : i32
    %c0_i32_1 = arith.constant 0 : i32
    return %c0_i32, %c0_i32_0 : i32, i32
  }
  func.func @transform_4(%arg0: i32) -> (i32, i32) {
    %c0_i32 = arith.constant 0 : i32
    %c0_i32_0 = arith.constant 0 : i32
    %c0_i32_1 = arith.constant 0 : i32
    return %c0_i32, %c0_i32_0 : i32, i32
  }
  func.func @transform_5(%arg0: i32) -> (i32, i32) {
    %c0_i32 = arith.constant 0 : i32
    %c0_i32_0 = arith.constant 0 : i32
    %c0_i32_1 = arith.constant 0 : i32
    return %c0_i32, %c0_i32_0 : i32, i32
  }
  func.func @transform_6(%arg0: i32) -> (i32, i32) {
    %c0_i32 = arith.constant 0 : i32
    %c0_i32_0 = arith.constant 0 : i32
    %c0_i32_1 = arith.constant 0 : i32
    return %c0_i32, %c0_i32_0 : i32, i32
  }
  func.func @transform_7(%arg0: i32) -> (i32, i32) {
    %c0_i32 = arith.constant 0 : i32
    %c0_i32_0 = arith.constant 0 : i32
    %c0_i32_1 = arith.constant 0 : i32
    return %c0_i32, %c0_i32_0 : i32, i32
  }
  func.func @transform_8(%arg0: i32) -> (i32, i32) {
    %c0_i32 = arith.constant 0 : i32
    %c0_i32_0 = arith.constant 0 : i32
    %c0_i32_1 = arith.constant 0 : i32
    return %c0_i32, %c0_i32_0 : i32, i32
  }
  func.func @transform_9(%arg0: i32) -> (i32, i32) {
    %c0_i32 = arith.constant 0 : i32
    %c0_i32_0 = arith.constant 0 : i32
    return %arg0, %c0_i32 : i32, i32
  }
  func.func @transform_10(%arg0: i32) -> (i32, i32) {
    %c0_i32 = arith.constant 0 : i32
    %c0_i32_0 = arith.constant 0 : i32
    return %arg0, %c0_i32 : i32, i32
  }
  func.func @transform_11(%arg0: i32) -> (i32, i32) {
    %c0_i32 = arith.constant 0 : i32
    %c0_i32_0 = arith.constant 0 : i32
    return %arg0, %c0_i32 : i32, i32
  }
  func.func @transform_12(%arg0: i32) -> (i32, i32) {
    %c0_i32 = arith.constant 0 : i32
    %c0_i32_0 = arith.constant 0 : i32
    return %arg0, %c0_i32 : i32, i32
  }
  func.func @transform_13(%arg0: i32) -> (i32, i32) {
    %c0_i32 = arith.constant 0 : i32
    %c0_i32_0 = arith.constant 0 : i32
    return %arg0, %c0_i32 : i32, i32
  }
  func.func @transform_14(%arg0: i32) -> (i32, i32) {
    %c0_i32 = arith.constant 0 : i32
    %c0_i32_0 = arith.constant 0 : i32
    return %arg0, %c0_i32 : i32, i32
  }
}

</mosaic_0001>

<bundles_post_ra>
// kernel: forward.1
= control target key start
LH: loop header
LB: loop body
LE: loop exit
PB: predicated region body
PF: predicated region fallthrough
CT: control target
= control target key end

     0   :  { %s3707_s1 = inlined_call_operand.vmem [shape: f32[128,128], index: 1, kind: input, shape index: {}]   ;;  %s3708_s0 = inlined_call_operand.vmem [shape: f32[256,128], index: 0, kind: input, shape index: {}]   ;;  %s3709_s3 = inlined_call_operand.vmem [shape: f32[128,256], index: 3, kind: input, shape index: {}]   ;;  %s3710_s2 = inlined_call_operand.vmem [shape: f32[1,128], index: 2, kind: input, shape index: {}]   ;;  %s3711_s5 = inlined_call_operand.vmem [shape: f32[128,128], index: 5, kind: input, shape index: {}]   ;;  %s3712_s4 = inlined_call_operand.vmem [shape: f32[1,256], index: 4, kind: input, shape index: {}]   ;;  %s3713_s10 = inlined_call_operand.vmem [shape: f32[256,128], index: 10, kind: output, shape index: {0}]   ;;  %s3714_s11 = inlined_call_operand.vmem [shape: f32[256,128], index: 11, kind: output, shape index: {1}]   ;;  %s3715_s9 = inlined_call_operand.vmem [shape: f32[256,128], index: 9, kind: input, shape index: {}]   ;;  %s3716_s7 = inlined_call_operand.vmem [shape: f32[128,128], index: 7, kind: input, shape index: {}]   ;;  %s3717_s12 = inlined_call_operand.vmem [shape: f32[256,128], index: 12, kind: output, shape index: {2}]   ;;  %s3718_s6 = inlined_call_operand.vmem [shape: f32[1,128], index: 6, kind: input, shape index: {}]   ;;  %s3719_s13 = inlined_call_operand.vmem [shape: f32[256,128], index: 13, kind: output, shape index: {3}]   ;;  %s3720_s8 = inlined_call_operand.vmem [shape: f32[1,128], index: 8, kind: input, shape index: {}]   ;;  %s3721_s14 = inlined_call_operand.vmem [shape: f32[256,128], index: 14, kind: output, shape index: {4}]  }
   0x1   :  { %v87_v0 = vld [vmem:[%s3707_s1 + $0x78] sm:$0xff]  ;;  %v86_v1 = vld [vmem:[%s3707_s1 + $0x70] sm:$0xff]  ;;  %v85_v2 = vld [vmem:[%s3707_s1 + $0x68] sm:$0xff] }
   0x2   :  { %1924 = vmatprep.subr.mxu0 %v87_v0  ;;  %2164 = vmatprep.subr.mxu1 %v87_v0  ;;  %v84_v3 = vld [vmem:[%s3707_s1 + $0x60] sm:$0xff]  ;;  %v83_v5 = vld [vmem:[%s3707_s1 + $0x58] sm:$0xff]  ;;  %v82_v6 = vld [vmem:[%s3707_s1 + $0x50] sm:$0xff] }
   0x3   :  { %1925 = vmatpush3.msra.mxu0 %v87_v0  ;;  %2180 = vmatpush3.msra.mxu1 %v87_v0  ;;  %v40_v4 = vld [vmem:[%s3708_s0] sm:$0xff]  ;;  %v81_v7 = vld [vmem:[%s3707_s1 + $0x48] sm:$0xff]  ;;  %v79_v9 = vld [vmem:[%s3707_s1 + $0x38] sm:$0xff] }
   0x4   :  { %1926 = vmatprep.subr.mxu0 %v86_v1  ;;  %2165 = vmatprep.subr.mxu1 %v86_v1  ;;  %v80_v8 = vld [vmem:[%s3707_s1 + $0x40] sm:$0xff]  ;;  %v78_v10 = vld [vmem:[%s3707_s1 + $0x30] sm:$0xff]  ;;  %v77_v11 = vld [vmem:[%s3707_s1 + $0x28] sm:$0xff] }
   0x5   :  { %1927 = vmatpush3.msra.mxu0 %v86_v1  ;;  %2181 = vmatpush3.msra.mxu1 %v86_v1  ;;  %v76_v12 = vld [vmem:[%s3707_s1 + $0x20] sm:$0xff]  ;;  %v75_v13 = vld [vmem:[%s3707_s1 + $0x18] sm:$0xff]  ;;  %v74_v14 = vld [vmem:[%s3707_s1 + $0x10] sm:$0xff] }
   0x6   :  { %1928 = vmatprep.subr.mxu0 %v85_v2  ;;  %2166 = vmatprep.subr.mxu1 %v85_v2  ;;  %v73_v15 = vld [vmem:[%s3707_s1 + $0x8] sm:$0xff]  ;;  %v72_v16 = vld [vmem:[%s3707_s1] sm:$0xff]  ;;  %v42_v18 = vld [vmem:[%s3708_s0 + $0x10] sm:$0xff] }
   0x7   :  { %1929 = vmatpush3.msra.mxu0 %v85_v2  ;;  %1956 = vmatprep.mubr.f32.mxu0 %v40_v4  ;;  %v41_v17 = vld [vmem:[%s3708_s0 + $0x8] sm:$0xff]  ;;  %v56_v19 = vld [vmem:[%s3708_s0 + $0x80] sm:$0xff]  ;;  %v383_v21 = vld [vmem:[%s3709_s3 + $0xf8] sm:$0xff] }
   0x8   :  { %1930 = vmatprep.subr.mxu0 %v84_v3  ;;  %2182 = vmatpush3.msra.mxu1 %v85_v2  ;;  %v57_v20 = vld [vmem:[%s3708_s0 + $0x88] sm:$0xff]  ;;  %v58_v22 = vld [vmem:[%s3708_s0 + $0x90] sm:$0xff]  ;;  %v43_v24 = vld [vmem:[%s3708_s0 + $0x18] sm:$0xff] }
   0x9   :  { %1931 = vmatpush3.msra.mxu0 %v84_v3  ;;  %2167 = vmatprep.subr.mxu1 %v84_v3  ;;  %v382_v23 = vld [vmem:[%s3709_s3 + $0xf0] sm:$0xff]  ;;  %v381_v25 = vld [vmem:[%s3709_s3 + $0xe8] sm:$0xff]  ;;  %v44_v26 = vld [vmem:[%s3708_s0 + $0x20] sm:$0xff] }
   0xa   :  { %1932 = vmatprep.subr.mxu0 %v83_v5  ;;  %2183 = vmatpush3.msra.mxu1 %v84_v3  ;;  %v380_v27 = vld [vmem:[%s3709_s3 + $0xe0] sm:$0xff]  ;;  %v59_v28 = vld [vmem:[%s3708_s0 + $0x98] sm:$0xff]  ;;  %v378_v31 = vld [vmem:[%s3709_s3 + $0xd0] sm:$0xff] }
   0xb   :  { %1933 = vmatpush3.msra.mxu0 %v83_v5  ;;  %2168 = vmatprep.subr.mxu1 %v83_v5  ;;  %v379_v29 = vld [vmem:[%s3709_s3 + $0xd8] sm:$0xff]  ;;  %v60_v30 = vld [vmem:[%s3708_s0 + $0xa0] sm:$0xff]  ;;  %v45_v32 = vld [vmem:[%s3708_s0 + $0x28] sm:$0xff] }
   0xc   :  { %1934 = vmatprep.subr.mxu0 %v82_v6  ;;  %2184 = vmatpush3.msra.mxu1 %v83_v5  ;;  %v377_v33 = vld [vmem:[%s3709_s3 + $0xc8] sm:$0xff]  ;;  %v46_v34 = vld [vmem:[%s3708_s0 + $0x30] sm:$0xff]  ;;  %v376_v35 = vld [vmem:[%s3709_s3 + $0xc0] sm:$0xff] }
   0xd   :  { %1935 = vmatpush3.msra.mxu0 %v82_v6  ;;  %2169 = vmatprep.subr.mxu1 %v82_v6  ;;  %v61_v36 = vld [vmem:[%s3708_s0 + $0xa8] sm:$0xff]  ;;  %v375_v37 = vld [vmem:[%s3709_s3 + $0xb8] sm:$0xff]  ;;  %v62_v38 = vld [vmem:[%s3708_s0 + $0xb0] sm:$0xff] }
   0xe   :  { %1936 = vmatprep.subr.mxu0 %v81_v7  ;;  %2185 = vmatpush3.msra.mxu1 %v82_v6  ;;  %v374_v39 = vld [vmem:[%s3709_s3 + $0xb0] sm:$0xff]  ;;  %v47_v40 = vld [vmem:[%s3708_s0 + $0x38] sm:$0xff]  ;;  %v373_v41 = vld [vmem:[%s3709_s3 + $0xa8] sm:$0xff] }
   0xf   :  { %1937 = vmatpush3.msra.mxu0 %v81_v7  ;;  %2170 = vmatprep.subr.mxu1 %v81_v7  ;;  %v48_v42 = vld [vmem:[%s3708_s0 + $0x40] sm:$0xff]  ;;  %v63_v44 = vld [vmem:[%s3708_s0 + $0xb8] sm:$0xff]  ;;  %v370_v47 = vld [vmem:[%s3709_s3 + $0x90] sm:$0xff] }
  0x10   :  { %1938 = vmatprep.subr.mxu0 %v80_v8  ;;  %2186 = vmatpush3.msra.mxu1 %v81_v7  ;;  %v372_v43 = vld [vmem:[%s3709_s3 + $0xa0] sm:$0xff]  ;;  %v371_v45 = vld [vmem:[%s3709_s3 + $0x98] sm:$0xff]  ;;  %v49_v48 = vld [vmem:[%s3708_s0 + $0x48] sm:$0xff] }
  0x11   :  { %1939 = vmatpush3.msra.mxu0 %v80_v8  ;;  %2171 = vmatprep.subr.mxu1 %v80_v8  ;;  %v64_v46 = vld [vmem:[%s3708_s0 + $0xc0] sm:$0xff]  ;;  %v369_v49 = vld [vmem:[%s3709_s3 + $0x88] sm:$0xff]  ;;  %v50_v50 = vld [vmem:[%s3708_s0 + $0x50] sm:$0xff] }
  0x12   :  { %1940 = vmatprep.subr.mxu0 %v79_v9  ;;  %2187 = vmatpush3.msra.mxu1 %v80_v8  ;;  %v368_v51 = vld [vmem:[%s3709_s3 + $0x80] sm:$0xff]  ;;  %v65_v52 = vld [vmem:[%s3708_s0 + $0xc8] sm:$0xff]  ;;  %v367_v53 = vld [vmem:[%s3709_s3 + $0x78] sm:$0xff] }
  0x13   :  { %1941 = vmatpush3.msra.mxu0 %v79_v9  ;;  %2172 = vmatprep.subr.mxu1 %v79_v9  ;;  %v66_v54 = vld [vmem:[%s3708_s0 + $0xd0] sm:$0xff]  ;;  %v51_v56 = vld [vmem:[%s3708_s0 + $0x58] sm:$0xff]  ;;  %v365_v57 = vld [vmem:[%s3709_s3 + $0x68] sm:$0xff] }
  0x14   :  { %1942 = vmatprep.subr.mxu0 %v78_v10  ;;  %2188 = vmatpush3.msra.mxu1 %v79_v9  ;;  %v366_v55 = vld [vmem:[%s3709_s3 + $0x70] sm:$0xff]  ;;  %v52_v58 = vld [vmem:[%s3708_s0 + $0x60] sm:$0xff]  ;;  %v67_v60 = vld [vmem:[%s3708_s0 + $0xd8] sm:$0xff] }
  0x15   :  { %1943 = vmatpush3.msra.mxu0 %v78_v10  ;;  %2173 = vmatprep.subr.mxu1 %v78_v10  ;;  %v364_v59 = vld [vmem:[%s3709_s3 + $0x60] sm:$0xff]  ;;  %v363_v61 = vld [vmem:[%s3709_s3 + $0x58] sm:$0xff]  ;;  %v362_v63 = vld [vmem:[%s3709_s3 + $0x50] sm:$0xff] }
  0x16   :  { %1944 = vmatprep.subr.mxu0 %v77_v11  ;;  %2189 = vmatpush3.msra.mxu1 %v78_v10  ;;  %v68_v62 = vld [vmem:[%s3708_s0 + $0xe0] sm:$0xff]  ;;  %v53_v0 = vld [vmem:[%s3708_s0 + $0x68] sm:$0xff]  ;;  %v54_v2 = vld [vmem:[%s3708_s0 + $0x70] sm:$0xff] }
  0x17   :  { %1945 = vmatpush3.msra.mxu0 %v77_v11  ;;  %2174 = vmatprep.subr.mxu1 %v77_v11  ;;  %v361_v1 = vld [vmem:[%s3709_s3 + $0x48] sm:$0xff]  ;;  %v360_v3 = vld [vmem:[%s3709_s3 + $0x40] sm:$0xff]  ;;  %v359_v5 = vld [vmem:[%s3709_s3 + $0x38] sm:$0xff] }
  0x18   :  { %1946 = vmatprep.subr.mxu0 %v76_v12  ;;  %2190 = vmatpush3.msra.mxu1 %v77_v11  ;;  %v69_v4 = vld [vmem:[%s3708_s0 + $0xe8] sm:$0xff]  ;;  %v70_v6 = vld [vmem:[%s3708_s0 + $0xf0] sm:$0xff]  ;;  %v55_v8 = vld [vmem:[%s3708_s0 + $0x78] sm:$0xff] }
  0x19   :  { %1947 = vmatpush3.msra.mxu0 %v76_v12  ;;  %2175 = vmatprep.subr.mxu1 %v76_v12  ;;  %v358_v7 = vld [vmem:[%s3709_s3 + $0x30] sm:$0xff]  ;;  %v71_v9 = vld [vmem:[%s3708_s0 + $0xf8] sm:$0xff]  ;;  %v357_v10 = vld [vmem:[%s3709_s3 + $0x28] sm:$0xff] }
  0x1a   :  { %1948 = vmatprep.subr.mxu0 %v75_v13  ;;  %2191 = vmatpush3.msra.mxu1 %v76_v12  ;;  %v356_v11 = vld [vmem:[%s3709_s3 + $0x20] sm:$0xff]  ;;  %v355_v12 = vld [vmem:[%s3709_s3 + $0x18] sm:$0xff] }
  0x1b   :  { %1949 = vmatpush3.msra.mxu0 %v75_v13  ;;  %2176 = vmatprep.subr.mxu1 %v75_v13 }
  0x1c   :  { %1950 = vmatprep.subr.mxu0 %v74_v14  ;;  %2192 = vmatpush3.msra.mxu1 %v75_v13  ;;  %v354_v13 = vld [vmem:[%s3709_s3 + $0x10] sm:$0xff] }
  0x1d   :  { %1951 = vmatpush3.msra.mxu0 %v74_v14  ;;  %2177 = vmatprep.subr.mxu1 %v74_v14 }
  0x1e   :  { %1952 = vmatprep.subr.mxu0 %v73_v15  ;;  %2193 = vmatpush3.msra.mxu1 %v74_v14  ;;  %v353_v14 = vld [vmem:[%s3709_s3 + $0x8] sm:$0xff] }
  0x1f   :  { %1953 = vmatpush3.msra.mxu0 %v73_v15  ;;  %2178 = vmatprep.subr.mxu1 %v73_v15 }
  0x20   :  { %1954 = vmatprep.subr.mxu0 %v72_v16  ;;  %2194 = vmatpush3.msra.mxu1 %v73_v15  ;;  %v352_v15 = vld [vmem:[%s3709_s3] sm:$0xff] }
  0x21   :  { %1955 = vmatpush3.msra.mxu0 %v72_v16  ;;  %2179 = vmatprep.subr.mxu1 %v72_v16 }
  0x22   :  { %1957 = vmatmul.mubr.f32.vlgmr.msra.gmra.mxu0 %v41_v17  ;;  %2195 = vmatpush3.msra.mxu1 %v72_v16  ;;  %v2389_v16 = vmov 0.0  }
  0x23   :  { %1959 = vmatprep.mubr.f32.mxu0 %v42_v18  ;;  %1980 = vmatprep.mubr.f32.mxu1 %v56_v19  ;;  %v2709_v18 = vld [vmem:[%s3710_s2] ss:$0 sm:$0xff] }
  0x24   :  { %1981 = vmatmul.mubr.f32.vlgmr.msra.gmra.mxu1 %v57_v20  ;;  %396 = vmatprep.subr.mxu1 %v383_v21 }
  0x25   :  { %1983 = vmatprep.mubr.f32.mxu1 %v58_v22  ;;  %397 = vmatpush1.msra.mxu1 %v382_v23  ;;  %v860_v22 = vld [vmem:[%s3711_s5 + $0x78] sm:$0xff] }
  0x26   :  { %1960 = vmatmul.mubr.f32.gmra.mxu0 %v43_v24  ;;  %398 = vmatprep.subr.mxu1 %v381_v25 }
  0x27   :  { %1962 = vmatprep.mubr.f32.mxu0 %v44_v26  ;;  %399 = vmatpush1.msra.mxu1 %v380_v27 }
  0x28   :  { %1984 = vmatmul.mubr.f32.gmra.mxu1 %v59_v28  ;;  %400 = vmatprep.subr.mxu1 %v379_v29 }
  0x29   :  { %1986 = vmatprep.mubr.f32.mxu1 %v60_v30  ;;  %401 = vmatpush1.msra.mxu1 %v378_v31 }
  0x2a   :  { %1963 = vmatmul.mubr.f32.gmra.mxu0 %v45_v32  ;;  %402 = vmatprep.subr.mxu1 %v377_v33 }
  0x2b   :  { %1965 = vmatprep.mubr.f32.mxu0 %v46_v34  ;;  %403 = vmatpush1.msra.mxu1 %v376_v35 }
  0x2c   :  { %1987 = vmatmul.mubr.f32.gmra.mxu1 %v61_v36  ;;  %404 = vmatprep.subr.mxu1 %v375_v37 }
  0x2d   :  { %1989 = vmatprep.mubr.f32.mxu1 %v62_v38  ;;  %405 = vmatpush1.msra.mxu1 %v374_v39 }
  0x2e   :  { %1966 = vmatmul.mubr.f32.gmra.mxu0 %v47_v40  ;;  %406 = vmatprep.subr.mxu1 %v373_v41 }
  0x2f   :  { %1968 = vmatprep.mubr.f32.mxu0 %v48_v42  ;;  %407 = vmatpush1.msra.mxu1 %v372_v43 }
  0x30   :  { %1990 = vmatmul.mubr.f32.gmra.mxu1 %v63_v44  ;;  %408 = vmatprep.subr.mxu1 %v371_v45 }
  0x31   :  { %1992 = vmatprep.mubr.f32.mxu1 %v64_v46  ;;  %409 = vmatpush1.msra.mxu1 %v370_v47 }
  0x32   :  { %1969 = vmatmul.mubr.f32.gmra.mxu0 %v49_v48  ;;  %410 = vmatprep.subr.mxu1 %v369_v49 }
  0x33   :  { %1971 = vmatprep.mubr.f32.mxu0 %v50_v50  ;;  %411 = vmatpush1.msra.mxu1 %v368_v51 }
  0x34   :  { %1993 = vmatmul.mubr.f32.gmra.mxu1 %v65_v52  ;;  %412 = vmatprep.subr.mxu1 %v367_v53 }
  0x35   :  { %1995 = vmatprep.mubr.f32.mxu1 %v66_v54  ;;  %413 = vmatpush1.msra.mxu1 %v366_v55 }
  0x36   :  { %1972 = vmatmul.mubr.f32.gmra.mxu0 %v51_v56  ;;  %414 = vmatprep.subr.mxu1 %v365_v57 }
  0x37   :  { %1974 = vmatprep.mubr.f32.mxu0 %v52_v58  ;;  %415 = vmatpush1.msra.mxu1 %v364_v59 }
  0x38   :  { %1996 = vmatmul.mubr.f32.gmra.mxu1 %v67_v60  ;;  %416 = vmatprep.subr.mxu1 %v363_v61 }
  0x39   :  { %1998 = vmatprep.mubr.f32.mxu1 %v68_v62  ;;  %417 = vmatpush1.msra.mxu1 %v362_v63 }
  0x3a   :  { %1975 = vmatmul.mubr.f32.gmra.mxu0 %v53_v0  ;;  %418 = vmatprep.subr.mxu1 %v361_v1 }
  0x3b   :  { %1977 = vmatprep.mubr.f32.mxu0 %v54_v2  ;;  %419 = vmatpush1.msra.mxu1 %v360_v3 }
  0x3c   :  { %1999 = vmatmul.mubr.f32.gmra.mxu1 %v69_v4  ;;  %420 = vmatprep.subr.mxu1 %v359_v5 }
  0x3d   :  { %2001 = vmatprep.mubr.f32.mxu1 %v70_v6  ;;  %421 = vmatpush1.msra.mxu1 %v358_v7 }
  0x3e   :  { %1978 = vmatmul.mubr.f32.gmra.mxu0 %v55_v8  ;;  %422 = vmatprep.subr.mxu1 %v357_v10  ;;  %v859_v10 = vld [vmem:[%s3711_s5 + $0x70] sm:$0xff] }
  0x3f   :  { %423 = vmatpush1.msra.mxu1 %v356_v11  ;;  %2004 = vmatprep.subr.mxu0 %v860_v22 }
  0x40   :  { %2002 = vmatmul.mubr.f32.gmra.mxu1 %v71_v9  ;;  %424 = vmatprep.subr.mxu1 %v355_v12 }
  0x41   :  { %425 = vmatpush1.msra.mxu1 %v354_v13  ;;  %460 = vmatprep.mubr.f32.mxu1 %v2389_v16  ;;  %v858_v13 = vld [vmem:[%s3711_s5 + $0x68] sm:$0xff] }
  0x42   :  { %426 = vmatprep.subr.mxu1 %v353_v14  ;;  %2005 = vmatpush3.msra.mxu0 %v860_v22  ;;  %v855_v22 = vld [vmem:[%s3711_s5 + $0x50] sm:$0xff] }
  0x43   :  { %427 = vmatpush1.msra.mxu1 %v352_v15  ;;  %2006 = vmatprep.subr.mxu0 %v859_v10  ;;  %v857_v15 = vld [vmem:[%s3711_s5 + $0x60] sm:$0xff] }
  0x44   :  { %2007 = vmatpush3.msra.mxu0 %v859_v10 }
  0x45   :  { %2008 = vmatprep.subr.mxu0 %v858_v13 }
  0x46   :  { %2009 = vmatpush3.msra.mxu0 %v858_v13 }
  0x47   :  { %2010 = vmatprep.subr.mxu0 %v857_v15 }
  0x48   :  { %2011 = vmatpush3.msra.mxu0 %v857_v15 }
  0xe2   :  { %v1958_v17 = vpop.f32.mrf.mxu0 }
  0xe3   :  { %v167_v23 = vadd.f32 %v1958_v17, %v2709_v18 }
  0xe4   :  { %v161_v19 = vpop.f32.mrf.mxu0  ;;  %v1982_v0 = vpop.f32.mrf.mxu1 }
  0xe5   :  { %v162_v20 = vadd.f32 %v2709_v18, %v161_v19  ;;  %v321_v26 = vmax.f32 %v167_v23, 0.0  ;;  %v247_v7 = vadd.f32 %v1982_v0, %v2709_v18 }
  0xe6   :  { %v1961_v21 = vpop.f32.mrf.mxu0  ;;  %v241_v3 = vpop.f32.mrf.mxu1 }
  0xe7   :  { %v320_v24 = vmax.f32 %v162_v20, 0.0  ;;  %v177_v29 = vadd.f32 %v1961_v21, %v2709_v18  ;;  %v242_v5 = vadd.f32 %v2709_v18, %v241_v3  ;;  %v337_v11 = vmax.f32 %v247_v7, 0.0  ;;  %v856_v20 = vld [vmem:[%s3711_s5 + $0x58] sm:$0xff]  ;;  %v384_v7 = vld [vmem:[%s3712_s4] sm:$0x3] }
  0xe8   :  { %v171_v25 = vpop.f32.mrf.mxu0  ;;  %v1985_v6 = vpop.f32.mrf.mxu1  ;;  %2012 = vmatprep.subr.mxu0 %v856_v20 }
  0xe9   :  { %461 = vmatmul.mubr.f32.vlgmr.msra.gmra.mxu1 %v320_v24  ;;  %v172_v27 = vadd.f32 %v2709_v18, %v171_v25  ;;  %v323_v32 = vmax.f32 %v177_v29, 0.0  ;;  %v336_v8 = vmax.f32 %v242_v5, 0.0  ;;  %v257_v17 = vadd.f32 %v1985_v6, %v2709_v18  ;;  %2013 = vmatpush3.msra.mxu0 %v856_v20  ;;  %v854_v25 = vld [vmem:[%s3711_s5 + $0x48] sm:$0xff] }
  0xea   :  { %466 = vmatprep.mubr.f32.mxu1 %v2389_v16  ;;  %v1964_v28 = vpop.f32.mrf.mxu0  ;;  %v251_v9 = vpop.f32.mrf.mxu1  ;;  %2014 = vmatprep.subr.mxu0 %v855_v22 }
  0xeb   :  { %v322_v30 = vmax.f32 %v172_v27, 0.0  ;;  %v187_v35 = vadd.f32 %v1964_v28, %v2709_v18  ;;  %v252_v12 = vadd.f32 %v2709_v18, %v251_v9  ;;  %v339_v23 = vmax.f32 %v257_v17, 0.0  ;;  %2015 = vmatpush3.msra.mxu0 %v855_v22  ;;  %v853_v27 = vld [vmem:[%s3711_s5 + $0x40] sm:$0xff] }
  0xec   :  { %v181_v31 = vpop.f32.mrf.mxu0  ;;  %v1988_v14 = vpop.f32.mrf.mxu1  ;;  %2016 = vmatprep.subr.mxu0 %v854_v25 }
  0xed   :  { %467 = vmatmul.mubr.f32.gmra.mxu1 %v321_v26  ;;  %v182_v33 = vadd.f32 %v2709_v18, %v181_v31  ;;  %v325_v38 = vmax.f32 %v187_v35, 0.0  ;;  %v338_v19 = vmax.f32 %v252_v12, 0.0  ;;  %2017 = vmatpush3.msra.mxu0 %v854_v25  ;;  %v267_v28 = vadd.f32 %v1988_v14, %v2709_v18  ;;  %v850_v35 = vld [vmem:[%s3711_s5 + $0x28] sm:$0xff] }
  0xee   :  { %472 = vmatprep.mubr.f32.mxu1 %v2389_v16  ;;  %v1967_v34 = vpop.f32.mrf.mxu0  ;;  %v261_v21 = vpop.f32.mrf.mxu1  ;;  %2018 = vmatprep.subr.mxu0 %v853_v27 }
  0xef   :  { %v324_v36 = vmax.f32 %v182_v33, 0.0  ;;  %v197_v41 = vadd.f32 %v1967_v34, %v2709_v18  ;;  %v262_v24 = vadd.f32 %v2709_v18, %v261_v21  ;;  %2019 = vmatpush3.msra.mxu0 %v853_v27  ;;  %v341_v33 = vmax.f32 %v267_v28, 0.0 }
  0xf0   :  { %v191_v37 = vpop.f32.mrf.mxu0  ;;  %v1991_v26 = vpop.f32.mrf.mxu1 }
  0xf1   :  { %473 = vmatmul.mubr.f32.gmra.mxu1 %v322_v30  ;;  %v192_v39 = vadd.f32 %v2709_v18, %v191_v37  ;;  %v327_v44 = vmax.f32 %v197_v41, 0.0  ;;  %v340_v29 = vmax.f32 %v262_v24, 0.0  ;;  %v852_v30 = vld [vmem:[%s3711_s5 + $0x38] sm:$0xff]  ;;  %v849_v37 = vld [vmem:[%s3711_s5 + $0x20] sm:$0xff] }
  0xf2   :  { %478 = vmatprep.mubr.f32.mxu1 %v2389_v16  ;;  %v1970_v40 = vpop.f32.mrf.mxu0  ;;  %v271_v31 = vpop.f32.mrf.mxu1  ;;  %2020 = vmatprep.subr.mxu0 %v852_v30 }
  0xf3   :  { %v326_v42 = vmax.f32 %v192_v39, 0.0  ;;  %v207_v47 = vadd.f32 %v1970_v40, %v2709_v18  ;;  %2021 = vmatpush3.msra.mxu0 %v852_v30  ;;  %v272_v34 = vadd.f32 %v2709_v18, %v271_v31  ;;  %v848_v40 = vld [vmem:[%s3711_s5 + $0x18] sm:$0xff] }
  0xf4   :  { %v201_v43 = vpop.f32.mrf.mxu0 }
  0xf5   :  { %479 = vmatmul.mubr.f32.gmra.mxu1 %v323_v32  ;;  %v202_v45 = vadd.f32 %v2709_v18, %v201_v43  ;;  %v329_v50 = vmax.f32 %v207_v47, 0.0  ;;  %v851_v32 = vld [vmem:[%s3711_s5 + $0x30] sm:$0xff]  ;;  %v342_v39 = vmax.f32 %v272_v34, 0.0  ;;  %v845_v47 = vld [vmem:[%s3711_s5] sm:$0xff] }
  0xf6   :  { %484 = vmatprep.mubr.f32.mxu1 %v2389_v16  ;;  %v1973_v46 = vpop.f32.mrf.mxu0  ;;  %2022 = vmatprep.subr.mxu0 %v851_v32 }
  0xf7   :  { %v328_v48 = vmax.f32 %v202_v45, 0.0  ;;  %v217_v53 = vadd.f32 %v1973_v46, %v2709_v18  ;;  %2023 = vmatpush3.msra.mxu0 %v851_v32  ;;  %v846_v45 = vld [vmem:[%s3711_s5 + $0x8] sm:$0xff] }
  0xf8   :  { %v211_v49 = vpop.f32.mrf.mxu0  ;;  %2024 = vmatprep.subr.mxu0 %v850_v35 }
  0xf9   :  { %485 = vmatmul.mubr.f32.gmra.mxu1 %v324_v36  ;;  %v212_v51 = vadd.f32 %v2709_v18, %v211_v49  ;;  %v331_v56 = vmax.f32 %v217_v53, 0.0  ;;  %v1994_v36 = vpop.f32.mrf.mxu1  ;;  %2025 = vmatpush3.msra.mxu0 %v850_v35 }
  0xfa   :  { %490 = vmatprep.mubr.f32.mxu1 %v2389_v16  ;;  %v1976_v52 = vpop.f32.mrf.mxu0  ;;  %2026 = vmatprep.subr.mxu0 %v849_v37 }
  0xfb   :  { %v330_v54 = vmax.f32 %v212_v51, 0.0  ;;  %v227_v59 = vadd.f32 %v1976_v52, %v2709_v18  ;;  %2027 = vmatpush3.msra.mxu0 %v849_v37  ;;  %v281_v41 = vpop.f32.mrf.mxu1 }
  0xfc   :  { %v221_v55 = vpop.f32.mrf.mxu0  ;;  %2028 = vmatprep.subr.mxu0 %v848_v40 }
  0xfd   :  { %491 = vmatmul.mubr.f32.gmra.mxu1 %v325_v38  ;;  %v222_v57 = vadd.f32 %v2709_v18, %v221_v55  ;;  %v333_v62 = vmax.f32 %v227_v59, 0.0  ;;  %v277_v38 = vadd.f32 %v1991_v26, %v2709_v18  ;;  %2029 = vmatpush3.msra.mxu0 %v848_v40  ;;  %v1997_v46 = vpop.f32.mrf.mxu1  ;;  %v653_v40 = vld [vmem:[%s3715_s9] sm:$0xff] }
  0xfe   :  { %496 = vmatprep.mubr.f32.mxu1 %v2389_v16  ;;  %v1979_v58 = vpop.f32.mrf.mxu0 }
  0xff   :  { %v332_v60 = vmax.f32 %v222_v57, 0.0  ;;  %v237_v1 = vadd.f32 %v1979_v58, %v2709_v18  ;;  %v343_v43 = vmax.f32 %v277_v38, 0.0 }
 0x100   :  { %v231_v61 = vpop.f32.mrf.mxu0 }
 0x101   :  { %497 = vmatmul.mubr.f32.gmra.mxu1 %v326_v42  ;;  %v232_v63 = vadd.f32 %v2709_v18, %v231_v61  ;;  %v335_v4 = vmax.f32 %v237_v1, 0.0  ;;  %v847_v42 = vld [vmem:[%s3711_s5 + $0x10] sm:$0xff] }
 0x102   :  { %502 = vmatprep.mubr.f32.mxu1 %v2389_v16  ;;  %2030 = vmatprep.subr.mxu0 %v847_v42 }
 0x103   :  { %v334_v2 = vmax.f32 %v232_v63, 0.0  ;;  %2031 = vmatpush3.msra.mxu0 %v847_v42 }
 0x104   :  { %2032 = vmatprep.subr.mxu0 %v846_v45 }
 0x105   :  { %503 = vmatmul.mubr.f32.gmra.mxu1 %v327_v44  ;;  %v282_v44 = vadd.f32 %v2709_v18, %v281_v41  ;;  %2033 = vmatpush3.msra.mxu0 %v846_v45 }
 0x106   :  { %508 = vmatprep.mubr.f32.mxu1 %v2389_v16  ;;  %2034 = vmatprep.subr.mxu0 %v845_v47 }
 0x107   :  { %v344_v49 = vmax.f32 %v282_v44, 0.0  ;;  %2035 = vmatpush3.msra.mxu0 %v845_v47 }
 0x109   :  { %509 = vmatmul.mubr.f32.gmra.mxu1 %v328_v48  ;;  %v287_v48 = vadd.f32 %v1994_v36, %v2709_v18 }
 0x10a   :  { %514 = vmatprep.mubr.f32.mxu1 %v2389_v16 }
 0x10b   :  { %v345_v51 = vmax.f32 %v287_v48, 0.0 }
 0x10d   :  { %515 = vmatmul.mubr.f32.gmra.mxu1 %v329_v50  ;;  %v291_v50 = vpop.f32.mrf.mxu1 }
 0x10e   :  { %520 = vmatprep.mubr.f32.mxu1 %v2389_v16  ;;  %v292_v52 = vadd.f32 %v2709_v18, %v291_v50  ;;  %v1140_v50 = vld [vmem:[%s3716_s7 + $0x78] sm:$0xff] }
 0x10f   :  { %v2000_v53 = vpop.f32.mrf.mxu1  ;;  %2084 = vmatprep.subr.mxu0 %v1140_v50 }
 0x110   :  { %v346_v55 = vmax.f32 %v292_v52, 0.0 }
 0x111   :  { %521 = vmatmul.mubr.f32.gmra.mxu1 %v330_v54  ;;  %v297_v54 = vadd.f32 %v1997_v46, %v2709_v18 }
 0x112   :  { %526 = vmatprep.mubr.f32.mxu1 %v2389_v16 }
 0x113   :  { %v347_v57 = vmax.f32 %v297_v54, 0.0 }
 0x115   :  { %527 = vmatmul.mubr.f32.gmra.mxu1 %v331_v56  ;;  %v301_v56 = vpop.f32.mrf.mxu1 }
 0x116   :  { %532 = vmatprep.mubr.f32.mxu1 %v2389_v16  ;;  %v302_v58 = vadd.f32 %v2709_v18, %v301_v56 }
 0x117   :  { %v2003_v59 = vpop.f32.mrf.mxu1 }
 0x118   :  { %v348_v61 = vmax.f32 %v302_v58, 0.0  ;;  %v317_v1 = vadd.f32 %v2003_v59, %v2709_v18 }
 0x119   :  { %533 = vmatmul.mubr.f32.gmra.mxu1 %v332_v60  ;;  %v307_v60 = vadd.f32 %v2000_v53, %v2709_v18 }
 0x11a   :  { %538 = vmatprep.mubr.f32.mxu1 %v2389_v16  ;;  %v351_v3 = vmax.f32 %v317_v1, 0.0 }
 0x11b   :  { %v349_v63 = vmax.f32 %v307_v60, 0.0  ;;  %v655_v60 = vld [vmem:[%s3715_s9 + $0x10] sm:$0xff] }
 0x11d   :  { %539 = vmatmul.mubr.f32.gmra.mxu1 %v333_v62  ;;  %v311_v62 = vpop.f32.mrf.mxu1 }
 0x11e   :  { %544 = vmatprep.mubr.f32.mxu1 %v2389_v16  ;;  %v312_v0 = vadd.f32 %v2709_v18, %v311_v62 }
 0x121   :  { %545 = vmatmul.mubr.f32.gmra.mxu1 %v334_v2  ;;  %v350_v2 = vmax.f32 %v312_v0, 0.0 }
 0x122   :  { %550 = vmatprep.mubr.f32.mxu1 %v2389_v16 }
 0x125   :  { %551 = vmatmul.mubr.f32.gmra.mxu1 %v335_v4  ;;  %v386_v4 = vlaneseq }
 0x126   :  { %556 = vmatprep.mubr.f32.mxu1 %v2389_v16 }
 0x127   :  { %v387_v5 = vshrl.u32 %v386_v4, 7 }
 0x129   :  { %557 = vmatmul.mubr.f32.gmra.mxu1 %v336_v8  ;;  %v388_v6 = vsub.s32 0, %v387_v5  ;;  %v392_v8 = vsub.s32 1, %v387_v5 }
 0x12a   :  { %562 = vmatprep.mubr.f32.mxu1 %v2389_v16 }
 0x12b   :  { %v2825_v9 = vrot.slane %v384_v7, %v388_v6  ;;  %v2827_v10 = vrot.slane %v384_v7, %v392_v8  ;;  %v656_v7 = vld [vmem:[%s3715_s9 + $0x18] sm:$0xff]  ;;  %v1138_v8 = vld [vmem:[%s3716_s7 + $0x68] sm:$0xff] }
 0x12d   :  { %563 = vmatmul.mubr.f32.gmra.mxu1 %v337_v11 }
 0x12e   :  { %568 = vmatprep.mubr.f32.mxu1 %v2389_v16 }
 0x131   :  { %569 = vmatmul.mubr.f32.gmra.mxu1 %v338_v19 }
 0x132   :  { %574 = vmatprep.mubr.f32.mxu1 %v2389_v16 }
 0x135   :  { %575 = vmatmul.mubr.f32.gmra.mxu1 %v339_v23 }
 0x136   :  { %580 = vmatprep.mubr.f32.mxu1 %v2389_v16 }
 0x139   :  { %581 = vmatmul.mubr.f32.gmra.mxu1 %v340_v29 }
 0x13a   :  { %586 = vmatprep.mubr.f32.mxu1 %v2389_v16 }
 0x13d   :  { %587 = vmatmul.mubr.f32.gmra.mxu1 %v341_v33 }
 0x13e   :  { %592 = vmatprep.mubr.f32.mxu1 %v2389_v16 }
 0x141   :  { %593 = vmatmul.mubr.f32.gmra.mxu1 %v342_v39 }
 0x142   :  { %598 = vmatprep.mubr.f32.mxu1 %v2389_v16 }
 0x145   :  { %599 = vmatmul.mubr.f32.gmra.mxu1 %v343_v43 }
 0x146   :  { %604 = vmatprep.mubr.f32.mxu1 %v2389_v16 }
 0x149   :  { %605 = vmatmul.mubr.f32.gmra.mxu1 %v344_v49  ;;  %v654_v49 = vld [vmem:[%s3715_s9 + $0x8] sm:$0xff] }
 0x14a   :  { %610 = vmatprep.mubr.f32.mxu1 %v2389_v16 }
 0x14d   :  { %611 = vmatmul.mubr.f32.gmra.mxu1 %v345_v51 }
 0x14e   :  { %616 = vmatprep.mubr.f32.mxu1 %v2389_v16 }
 0x151   :  { %617 = vmatmul.mubr.f32.gmra.mxu1 %v346_v55 }
 0x152   :  { %622 = vmatprep.mubr.f32.mxu1 %v2389_v16 }
 0x155   :  { %623 = vmatmul.mubr.f32.gmra.mxu1 %v347_v57 }
 0x156   :  { %628 = vmatprep.mubr.f32.mxu1 %v2389_v16 }
 0x159   :  { %629 = vmatmul.mubr.f32.gmra.mxu1 %v348_v61 }
 0x15a   :  { %634 = vmatprep.mubr.f32.mxu1 %v2389_v16 }
 0x15d   :  { %635 = vmatmul.mubr.f32.gmra.mxu1 %v349_v63 }
 0x15e   :  { %640 = vmatprep.mubr.f32.mxu1 %v2389_v16 }
 0x161   :  { %641 = vmatmul.mubr.f32.gmra.mxu1 %v350_v2  ;;  %v1139_v2 = vld [vmem:[%s3716_s7 + $0x70] sm:$0xff] }
 0x162   :  { %646 = vmatprep.mubr.f32.mxu1 %v2389_v16 }
 0x165   :  { %647 = vmatmul.mubr.f32.gmra.mxu1 %v351_v3 }
 0x1a9   :  { %v462_v11 = vpop.f32.mrf.mxu1 }
 0x1aa   :  { %v463_v18 = vadd.f32 %v462_v11, %v2825_v9 }
 0x1ab   :  { %v464_v12 = vpop.f32.mrf.mxu1 }
 0x1ac   :  { %1565 = vst [vmem:[%s3713_s10] sm:$0xff] %v463_v18  ;;  %v465_v16 = vadd.f32 %v464_v12, %v2827_v10 }
 0x1ad   :  { %v468_v13 = vpop.f32.mrf.mxu1 }
 0x1ae   :  { %v685_v14 = vmul.f32 0.5, %v465_v16  ;;  %1597 = vst [vmem:[%s3714_s11] sm:$0xff] %v465_v16  ;;  %v2838_v15 = vadd.f32 %v468_v13, %v2825_v9 }
 0x1af   :  { %v470_v17 = vpop.f32.mrf.mxu1 }
 0x1b0   :  { %v717_v19 = vmul.f32 1.442695, %v685_v14  ;;  %1566 = vst [vmem:[%s3713_s10 + $0x8] sm:$0xff] %v2838_v15  ;;  %v471_v20 = vadd.f32 %v470_v17, %v2827_v10  ;;  %v1137_v14 = vld [vmem:[%s3716_s7 + $0x60] sm:$0xff] }
 0x1b1   :  { %v474_v21 = vpop.f32.mrf.mxu1 }
 0x1b2   :  { %2197 = vpow2.f32 %v717_v19  ;;  %v686_v22 = vmul.f32 0.5, %v471_v20  ;;  %1598 = vst [vmem:[%s3714_s11 + $0x8] sm:$0xff] %v471_v20  ;;  %v2849_v23 = vadd.f32 %v474_v21, %v2825_v9  ;;  %v657_v21 = vld [vmem:[%s3715_s9 + $0x20] sm:$0xff] }
 0x1b3   :  { %v476_v24 = vpop.f32.mrf.mxu1 }
 0x1b4   :  { %v719_v25 = vmul.f32 1.442695, %v686_v22  ;;  %1567 = vst [vmem:[%s3713_s10 + $0x10] sm:$0xff] %v2849_v23  ;;  %v477_v26 = vadd.f32 %v476_v24, %v2827_v10  ;;  %v1136_v22 = vld [vmem:[%s3716_s7 + $0x58] sm:$0xff] }
 0x1b5   :  { %v480_v27 = vpop.f32.mrf.mxu1 }
 0x1b6   :  { %2199 = vpow2.f32 %v719_v25  ;;  %v687_v28 = vmul.f32 0.5, %v477_v26  ;;  %1599 = vst [vmem:[%s3714_s11 + $0x10] sm:$0xff] %v477_v26  ;;  %v2860_v29 = vadd.f32 %v480_v27, %v2825_v9 }
 0x1b7   :  { %v482_v30 = vpop.f32.mrf.mxu1 }
 0x1b8   :  { %v721_v31 = vmul.f32 1.442695, %v687_v28  ;;  %1568 = vst [vmem:[%s3713_s10 + $0x18] sm:$0xff] %v2860_v29  ;;  %v483_v32 = vadd.f32 %v482_v30, %v2827_v10  ;;  %v1135_v28 = vld [vmem:[%s3716_s7 + $0x50] sm:$0xff] }
 0x1b9   :  { %v486_v33 = vpop.f32.mrf.mxu1 }
 0x1ba   :  { %2201 = vpow2.f32 %v721_v31  ;;  %v688_v34 = vmul.f32 0.5, %v483_v32  ;;  %1600 = vst [vmem:[%s3714_s11 + $0x18] sm:$0xff] %v483_v32  ;;  %v2871_v35 = vadd.f32 %v486_v33, %v2825_v9  ;;  %v658_v33 = vld [vmem:[%s3715_s9 + $0x28] sm:$0xff] }
 0x1bb   :  { %v488_v36 = vpop.f32.mrf.mxu1 }
 0x1bc   :  { %v723_v37 = vmul.f32 1.442695, %v688_v34  ;;  %1569 = vst [vmem:[%s3713_s10 + $0x20] sm:$0xff] %v2871_v35  ;;  %v489_v38 = vadd.f32 %v488_v36, %v2827_v10  ;;  %v1134_v34 = vld [vmem:[%s3716_s7 + $0x48] sm:$0xff] }
 0x1bd   :  { %v492_v39 = vpop.f32.mrf.mxu1 }
 0x1be   :  { %2203 = vpow2.f32 %v723_v37  ;;  %v689_v41 = vmul.f32 0.5, %v489_v38  ;;  %1601 = vst [vmem:[%s3714_s11 + $0x20] sm:$0xff] %v489_v38  ;;  %v2885_v42 = vadd.f32 %v492_v39, %v2825_v9 }
 0x1bf   :  { %v2198_v43 = vpop.eup %2197  ;;  %v494_v44 = vpop.f32.mrf.mxu1 }
 0x1c0   :  { %v725_v45 = vmul.f32 1.442695, %v689_v41  ;;  %1570 = vst [vmem:[%s3713_s10 + $0x28] sm:$0xff] %v2885_v42  ;;  %v495_v46 = vadd.f32 %v494_v44, %v2827_v10  ;;  %v781_v47 = vmul.f32 %v2198_v43, %v653_v40  ;;  %v1133_v41 = vld [vmem:[%s3716_s7 + $0x40] sm:$0xff] }
 0x1c1   :  { %v498_v48 = vpop.f32.mrf.mxu1 }
 0x1c2   :  { %2205 = vpow2.f32 %v725_v45  ;;  %v690_v51 = vmul.f32 0.5, %v495_v46  ;;  %1602 = vst [vmem:[%s3714_s11 + $0x28] sm:$0xff] %v495_v46  ;;  %v2902_v52 = vadd.f32 %v498_v48, %v2825_v9  ;;  %v813_v53 = vadd.f32 %v781_v47, %v463_v18  ;;  %v659_v46 = vld [vmem:[%s3715_s9 + $0x30] sm:$0xff]  ;;  %v1132_v47 = vld [vmem:[%s3716_s7 + $0x38] sm:$0xff] }
 0x1c3   :  { %v2200_v54 = vpop.eup %2199  ;;  %v500_v55 = vpop.f32.mrf.mxu1 }
 0x1c4   :  { %v727_v56 = vmul.f32 1.442695, %v690_v51  ;;  %1571 = vst [vmem:[%s3713_s10 + $0x30] sm:$0xff] %v2902_v52  ;;  %v501_v57 = vadd.f32 %v500_v55, %v2827_v10  ;;  %2036 = vmatprep.mubr.f32.mxu0 %v813_v53  ;;  %1629 = vst [vmem:[%s3717_s12] sm:$0xff] %v813_v53  ;;  %v782_v58 = vmul.f32 %v2200_v54, %v654_v49  ;;  %v1131_v54 = vld [vmem:[%s3716_s7 + $0x30] sm:$0xff] }
 0x1c5   :  { %v504_v59 = vpop.f32.mrf.mxu1 }
 0x1c6   :  { %2207 = vpow2.f32 %v727_v56  ;;  %v691_v61 = vmul.f32 0.5, %v501_v57  ;;  %1603 = vst [vmem:[%s3714_s11 + $0x30] sm:$0xff] %v501_v57  ;;  %v2919_v62 = vadd.f32 %v504_v59, %v2825_v9  ;;  %v814_v63 = vadd.f32 %v782_v58, %v2838_v15  ;;  %v660_v58 = vld [vmem:[%s3715_s9 + $0x38] sm:$0xff]  ;;  %v1130_v59 = vld [vmem:[%s3716_s7 + $0x28] sm:$0xff] }
 0x1c7   :  { %v2202_v0 = vpop.eup %2201  ;;  %v506_v1 = vpop.f32.mrf.mxu1 }
 0x1c8   :  { %v729_v3 = vmul.f32 1.442695, %v691_v61  ;;  %1572 = vst [vmem:[%s3713_s10 + $0x38] sm:$0xff] %v2919_v62  ;;  %v507_v4 = vadd.f32 %v506_v1, %v2827_v10  ;;  %2037 = vmatmul.mubr.f32.vlgmr.msra.gmra.mxu0 %v814_v63  ;;  %1630 = vst [vmem:[%s3717_s12 + $0x8] sm:$0xff] %v814_v63  ;;  %v783_v5 = vmul.f32 %v2202_v0, %v655_v60 }
 0x1c9   :  { %v510_v6 = vpop.f32.mrf.mxu1  ;;  %2085 = vmatpush3.msra.mxu0 %v1140_v50 }
 0x1ca   :  { %2209 = vpow2.f32 %v729_v3  ;;  %v692_v11 = vmul.f32 0.5, %v507_v4  ;;  %1604 = vst [vmem:[%s3714_s11 + $0x38] sm:$0xff] %v507_v4  ;;  %v2943_v18 = vadd.f32 %v510_v6, %v2825_v9  ;;  %v815_v12 = vadd.f32 %v783_v5, %v2849_v23  ;;  %2086 = vmatprep.subr.mxu0 %v1139_v2  ;;  %v661_v6 = vld [vmem:[%s3715_s9 + $0x40] sm:$0xff] }
 0x1cb   :  { %v2204_v16 = vpop.eup %2203  ;;  %v512_v13 = vpop.f32.mrf.mxu1  ;;  %2087 = vmatpush3.msra.mxu0 %v1139_v2  ;;  %v1129_v2 = vld [vmem:[%s3716_s7 + $0x20] sm:$0xff] }
 0x1cc   :  { %v731_v15 = vmul.f32 1.442695, %v692_v11  ;;  %1573 = vst [vmem:[%s3713_s10 + $0x40] sm:$0xff] %v2943_v18  ;;  %v513_v17 = vadd.f32 %v512_v13, %v2827_v10  ;;  %2039 = vmatprep.mubr.f32.mxu0 %v815_v12  ;;  %1631 = vst [vmem:[%s3717_s12 + $0x10] sm:$0xff] %v815_v12  ;;  %v784_v19 = vmul.f32 %v2204_v16, %v656_v7  ;;  %2088 = vmatprep.subr.mxu0 %v1138_v8 }
 0x1cd   :  { %v516_v20 = vpop.f32.mrf.mxu1  ;;  %2089 = vmatpush3.msra.mxu0 %v1138_v8 }
 0x1ce   :  { %2211 = vpow2.f32 %v731_v15  ;;  %v693_v23 = vmul.f32 0.5, %v513_v17  ;;  %1605 = vst [vmem:[%s3714_s11 + $0x40] sm:$0xff] %v513_v17  ;;  %v2967_v24 = vadd.f32 %v516_v20, %v2825_v9  ;;  %v816_v25 = vadd.f32 %v784_v19, %v2860_v29  ;;  %2090 = vmatprep.subr.mxu0 %v1137_v14 }
 0x1cf   :  { %v2206_v26 = vpop.eup %2205  ;;  %v518_v27 = vpop.f32.mrf.mxu1  ;;  %2091 = vmatpush3.msra.mxu0 %v1137_v14 }
 0x1d0   :  { %v733_v30 = vmul.f32 1.442695, %v693_v23  ;;  %1574 = vst [vmem:[%s3713_s10 + $0x48] sm:$0xff] %v2967_v24  ;;  %v519_v31 = vadd.f32 %v518_v27, %v2827_v10  ;;  %2040 = vmatmul.mubr.f32.gmra.mxu0 %v816_v25  ;;  %1632 = vst [vmem:[%s3717_s12 + $0x18] sm:$0xff] %v816_v25  ;;  %v785_v29 = vmul.f32 %v2206_v26, %v657_v21  ;;  %2092 = vmatprep.subr.mxu0 %v1136_v22 }
 0x1d1   :  { %v522_v32 = vpop.f32.mrf.mxu1  ;;  %2093 = vmatpush3.msra.mxu0 %v1136_v22 }
 0x1d2   :  { %2213 = vpow2.f32 %v733_v30  ;;  %v694_v36 = vmul.f32 0.5, %v519_v31  ;;  %1606 = vst [vmem:[%s3714_s11 + $0x48] sm:$0xff] %v519_v31  ;;  %v2991_v37 = vadd.f32 %v522_v32, %v2825_v9  ;;  %v817_v38 = vadd.f32 %v785_v29, %v2871_v35  ;;  %2094 = vmatprep.subr.mxu0 %v1135_v28 }
 0x1d3   :  { %v2208_v39 = vpop.eup %2207  ;;  %v524_v40 = vpop.f32.mrf.mxu1  ;;  %2095 = vmatpush3.msra.mxu0 %v1135_v28 }
 0x1d4   :  { %v735_v43 = vmul.f32 1.442695, %v694_v36  ;;  %1575 = vst [vmem:[%s3713_s10 + $0x50] sm:$0xff] %v2991_v37  ;;  %v525_v44 = vadd.f32 %v524_v40, %v2827_v10  ;;  %2042 = vmatprep.mubr.f32.mxu0 %v817_v38  ;;  %1633 = vst [vmem:[%s3717_s12 + $0x20] sm:$0xff] %v817_v38  ;;  %v786_v35 = vmul.f32 %v2208_v39, %v658_v33  ;;  %2096 = vmatprep.subr.mxu0 %v1134_v34 }
 0x1d5   :  { %v528_v45 = vpop.f32.mrf.mxu1  ;;  %2097 = vmatpush3.msra.mxu0 %v1134_v34 }
 0x1d6   :  { %2215 = vpow2.f32 %v735_v43  ;;  %v695_v48 = vmul.f32 0.5, %v525_v44  ;;  %1607 = vst [vmem:[%s3714_s11 + $0x50] sm:$0xff] %v525_v44  ;;  %v3015_v49 = vadd.f32 %v528_v45, %v2825_v9  ;;  %v818_v50 = vadd.f32 %v786_v35, %v2885_v42  ;;  %2098 = vmatprep.subr.mxu0 %v1133_v41 }
 0x1d7   :  { %v2210_v51 = vpop.eup %2209  ;;  %v530_v53 = vpop.f32.mrf.mxu1  ;;  %2099 = vmatpush3.msra.mxu0 %v1133_v41 }
 0x1d8   :  { %v737_v55 = vmul.f32 1.442695, %v695_v48  ;;  %1576 = vst [vmem:[%s3713_s10 + $0x58] sm:$0xff] %v3015_v49  ;;  %v531_v56 = vadd.f32 %v530_v53, %v2827_v10  ;;  %2043 = vmatmul.mubr.f32.gmra.mxu0 %v818_v50  ;;  %1634 = vst [vmem:[%s3717_s12 + $0x28] sm:$0xff] %v818_v50  ;;  %v787_v42 = vmul.f32 %v2210_v51, %v659_v46  ;;  %2100 = vmatprep.subr.mxu0 %v1132_v47 }
 0x1d9   :  { %v534_v57 = vpop.f32.mrf.mxu1  ;;  %2101 = vmatpush3.msra.mxu0 %v1132_v47 }
 0x1da   :  { %2217 = vpow2.f32 %v737_v55  ;;  %v696_v60 = vmul.f32 0.5, %v531_v56  ;;  %1608 = vst [vmem:[%s3714_s11 + $0x58] sm:$0xff] %v531_v56  ;;  %v3039_v61 = vadd.f32 %v534_v57, %v2825_v9  ;;  %v819_v63 = vadd.f32 %v787_v42, %v2902_v52  ;;  %2102 = vmatprep.subr.mxu0 %v1131_v54 }
 0x1db   :  { %v2212_v0 = vpop.eup %2211  ;;  %v536_v1 = vpop.f32.mrf.mxu1  ;;  %2103 = vmatpush3.msra.mxu0 %v1131_v54 }
 0x1dc   :  { %v739_v3 = vmul.f32 1.442695, %v696_v60  ;;  %1577 = vst [vmem:[%s3713_s10 + $0x60] sm:$0xff] %v3039_v61  ;;  %v537_v4 = vadd.f32 %v536_v1, %v2827_v10  ;;  %2045 = vmatprep.mubr.f32.mxu0 %v819_v63  ;;  %1635 = vst [vmem:[%s3717_s12 + $0x30] sm:$0xff] %v819_v63  ;;  %v788_v52 = vmul.f32 %v2212_v0, %v660_v58  ;;  %2104 = vmatprep.subr.mxu0 %v1130_v59 }
 0x1dd   :  { %v540_v5 = vpop.f32.mrf.mxu1  ;;  %2105 = vmatpush3.msra.mxu0 %v1130_v59 }
 0x1de   :  { %2219 = vpow2.f32 %v739_v3  ;;  %v697_v7 = vmul.f32 0.5, %v537_v4  ;;  %1609 = vst [vmem:[%s3714_s11 + $0x60] sm:$0xff] %v537_v4  ;;  %v3060_v8 = vadd.f32 %v540_v5, %v2825_v9  ;;  %v820_v11 = vadd.f32 %v788_v52, %v2919_v62  ;;  %2106 = vmatprep.subr.mxu0 %v1129_v2  ;;  %v662_v62 = vld [vmem:[%s3715_s9 + $0x48] sm:$0xff] }
 0x1df   :  { %v2214_v12 = vpop.eup %2213  ;;  %v542_v16 = vpop.f32.mrf.mxu1  ;;  %2107 = vmatpush3.msra.mxu0 %v1129_v2 }
 0x1e0   :  { %v741_v13 = vmul.f32 1.442695, %v697_v7  ;;  %1578 = vst [vmem:[%s3713_s10 + $0x68] sm:$0xff] %v3060_v8  ;;  %v543_v14 = vadd.f32 %v542_v16, %v2827_v10  ;;  %2046 = vmatmul.mubr.f32.gmra.mxu0 %v820_v11  ;;  %1636 = vst [vmem:[%s3717_s12 + $0x38] sm:$0xff] %v820_v11  ;;  %v789_v15 = vmul.f32 %v2214_v12, %v661_v6 }
 0x1e1   :  { %v546_v17 = vpop.f32.mrf.mxu1 }
 0x1e2   :  { %2221 = vpow2.f32 %v741_v13  ;;  %v698_v19 = vmul.f32 0.5, %v543_v14  ;;  %1610 = vst [vmem:[%s3714_s11 + $0x68] sm:$0xff] %v543_v14  ;;  %v3078_v20 = vadd.f32 %v546_v17, %v2825_v9  ;;  %v821_v21 = vadd.f32 %v789_v15, %v2943_v18  ;;  %v663_v18 = vld [vmem:[%s3715_s9 + $0x50] sm:$0xff] }
 0x1e3   :  { %v2216_v22 = vpop.eup %2215  ;;  %v548_v23 = vpop.f32.mrf.mxu1 }
 0x1e4   :  { %v743_v25 = vmul.f32 1.442695, %v698_v19  ;;  %1579 = vst [vmem:[%s3713_s10 + $0x70] sm:$0xff] %v3078_v20  ;;  %v549_v26 = vadd.f32 %v548_v23, %v2827_v10  ;;  %2048 = vmatprep.mubr.f32.mxu0 %v821_v21  ;;  %1637 = vst [vmem:[%s3717_s12 + $0x40] sm:$0xff] %v821_v21  ;;  %v790_v27 = vmul.f32 %v2216_v22, %v662_v62 }
 0x1e5   :  { %v552_v28 = vpop.f32.mrf.mxu1 }
 0x1e6   :  { %2223 = vpow2.f32 %v743_v25  ;;  %v699_v30 = vmul.f32 0.5, %v549_v26  ;;  %1611 = vst [vmem:[%s3714_s11 + $0x70] sm:$0xff] %v549_v26  ;;  %v3096_v31 = vadd.f32 %v552_v28, %v2825_v9  ;;  %v822_v29 = vadd.f32 %v790_v27, %v2967_v24  ;;  %v664_v24 = vld [vmem:[%s3715_s9 + $0x58] sm:$0xff] }
 0x1e7   :  { %v2218_v32 = vpop.eup %2217  ;;  %v554_v33 = vpop.f32.mrf.mxu1 }
 0x1e8   :  { %v745_v34 = vmul.f32 1.442695, %v699_v30  ;;  %1580 = vst [vmem:[%s3713_s10 + $0x78] sm:$0xff] %v3096_v31  ;;  %v555_v36 = vadd.f32 %v554_v33, %v2827_v10  ;;  %2049 = vmatmul.mubr.f32.gmra.mxu0 %v822_v29  ;;  %1638 = vst [vmem:[%s3717_s12 + $0x48] sm:$0xff] %v822_v29  ;;  %v791_v38 = vmul.f32 %v2218_v32, %v663_v18 }
 0x1e9   :  { %v558_v39 = vpop.f32.mrf.mxu1 }
 0x1ea   :  { %2225 = vpow2.f32 %v745_v34  ;;  %v700_v40 = vmul.f32 0.5, %v555_v36  ;;  %1612 = vst [vmem:[%s3714_s11 + $0x78] sm:$0xff] %v555_v36  ;;  %v3114_v41 = vadd.f32 %v558_v39, %v2825_v9  ;;  %v823_v43 = vadd.f32 %v791_v38, %v2991_v37  ;;  %v665_v37 = vld [vmem:[%s3715_s9 + $0x60] sm:$0xff] }
 0x1eb   :  { %v2220_v44 = vpop.eup %2219  ;;  %v560_v35 = vpop.f32.mrf.mxu1 }
 0x1ec   :  { %v747_v45 = vmul.f32 1.442695, %v700_v40  ;;  %1581 = vst [vmem:[%s3713_s10 + $0x80] sm:$0xff] %v3114_v41  ;;  %v561_v46 = vadd.f32 %v560_v35, %v2827_v10  ;;  %2051 = vmatprep.mubr.f32.mxu0 %v823_v43  ;;  %1639 = vst [vmem:[%s3717_s12 + $0x50] sm:$0xff] %v823_v43  ;;  %v792_v47 = vmul.f32 %v2220_v44, %v664_v24 }
 0x1ed   :  { %v564_v48 = vpop.f32.mrf.mxu1 }
 0x1ee   :  { %2227 = vpow2.f32 %v747_v45  ;;  %v701_v50 = vmul.f32 0.5, %v561_v46  ;;  %1613 = vst [vmem:[%s3714_s11 + $0x80] sm:$0xff] %v561_v46  ;;  %v3132_v51 = vadd.f32 %v564_v48, %v2825_v9  ;;  %v824_v53 = vadd.f32 %v792_v47, %v3015_v49  ;;  %v666_v49 = vld [vmem:[%s3715_s9 + $0x68] sm:$0xff] }
 0x1ef   :  { %v2222_v54 = vpop.eup %2221  ;;  %v566_v55 = vpop.f32.mrf.mxu1 }
 0x1f0   :  { %v749_v56 = vmul.f32 1.442695, %v701_v50  ;;  %1582 = vst [vmem:[%s3713_s10 + $0x88] sm:$0xff] %v3132_v51  ;;  %v567_v42 = vadd.f32 %v566_v55, %v2827_v10  ;;  %2052 = vmatmul.mubr.f32.gmra.mxu0 %v824_v53  ;;  %1640 = vst [vmem:[%s3717_s12 + $0x58] sm:$0xff] %v824_v53  ;;  %v793_v57 = vmul.f32 %v2222_v54, %v665_v37  ;;  %v1128_v55 = vld [vmem:[%s3716_s7 + $0x18] sm:$0xff] }
 0x1f1   :  { %v570_v58 = vpop.f32.mrf.mxu1  ;;  %2108 = vmatprep.subr.mxu0 %v1128_v55 }
 0x1f2   :  { %2229 = vpow2.f32 %v749_v56  ;;  %v702_v59 = vmul.f32 0.5, %v567_v42  ;;  %1614 = vst [vmem:[%s3714_s11 + $0x88] sm:$0xff] %v567_v42  ;;  %v3150_v60 = vadd.f32 %v570_v58, %v2825_v9  ;;  %v825_v63 = vadd.f32 %v793_v57, %v3039_v61  ;;  %v667_v61 = vld [vmem:[%s3715_s9 + $0x70] sm:$0xff]  ;;  %v672_v58 = vld [vmem:[%s3715_s9 + $0x98] sm:$0xff]  ;;  %2109 = vmatpush3.msra.mxu0 %v1128_v55 }
 0x1f3   :  { %v2224_v0 = vpop.eup %2223  ;;  %v572_v1 = vpop.f32.mrf.mxu1 }
 0x1f4   :  { %v751_v2 = vmul.f32 1.442695, %v702_v59  ;;  %1583 = vst [vmem:[%s3713_s10 + $0x90] sm:$0xff] %v3150_v60  ;;  %v573_v3 = vadd.f32 %v572_v1, %v2827_v10  ;;  %2054 = vmatprep.mubr.f32.mxu0 %v825_v63  ;;  %1641 = vst [vmem:[%s3717_s12 + $0x60] sm:$0xff] %v825_v63  ;;  %v794_v4 = vmul.f32 %v2224_v0, %v666_v49  ;;  %v1127_v49 = vld [vmem:[%s3716_s7 + $0x10] sm:$0xff] }
 0x1f5   :  { %v576_v52 = vpop.f32.mrf.mxu1  ;;  %2110 = vmatprep.subr.mxu0 %v1127_v49 }
 0x1f6   :  { %2231 = vpow2.f32 %v751_v2  ;;  %v703_v5 = vmul.f32 0.5, %v573_v3  ;;  %1615 = vst [vmem:[%s3714_s11 + $0x90] sm:$0xff] %v573_v3  ;;  %v3168_v6 = vadd.f32 %v576_v52, %v2825_v9  ;;  %v826_v7 = vadd.f32 %v794_v4, %v3060_v8  ;;  %v668_v8 = vld [vmem:[%s3715_s9 + $0x78] sm:$0xff]  ;;  %2111 = vmatpush3.msra.mxu0 %v1127_v49  ;;  %v1126_v3 = vld [vmem:[%s3716_s7 + $0x8] sm:$0xff] }
 0x1f7   :  { %v2226_v11 = vpop.eup %2225  ;;  %v578_v12 = vpop.f32.mrf.mxu1  ;;  %2112 = vmatprep.subr.mxu0 %v1126_v3 }
 0x1f8   :  { %v753_v16 = vmul.f32 1.442695, %v703_v5  ;;  %1584 = vst [vmem:[%s3713_s10 + $0x98] sm:$0xff] %v3168_v6  ;;  %v579_v13 = vadd.f32 %v578_v12, %v2827_v10  ;;  %2055 = vmatmul.mubr.f32.gmra.mxu0 %v826_v7  ;;  %1642 = vst [vmem:[%s3717_s12 + $0x68] sm:$0xff] %v826_v7  ;;  %v795_v14 = vmul.f32 %v2226_v11, %v667_v61  ;;  %v673_v5 = vld [vmem:[%s3715_s9 + $0xa0] sm:$0xff] }
 0x1f9   :  { %v582_v15 = vpop.f32.mrf.mxu1  ;;  %2113 = vmatpush3.msra.mxu0 %v1126_v3  ;;  %v1125_v7 = vld [vmem:[%s3716_s7] sm:$0xff] }
 0x1fa   :  { %2233 = vpow2.f32 %v753_v16  ;;  %v704_v17 = vmul.f32 0.5, %v579_v13  ;;  %1616 = vst [vmem:[%s3714_s11 + $0x98] sm:$0xff] %v579_v13  ;;  %v3186_v62 = vadd.f32 %v582_v15, %v2825_v9  ;;  %v827_v19 = vadd.f32 %v795_v14, %v3078_v20  ;;  %v669_v20 = vld [vmem:[%s3715_s9 + $0x80] sm:$0xff]  ;;  %2114 = vmatprep.subr.mxu0 %v1125_v7 }
 0x1fb   :  { %v2228_v21 = vpop.eup %2227  ;;  %v584_v22 = vpop.f32.mrf.mxu1  ;;  %2115 = vmatpush3.msra.mxu0 %v1125_v7 }
 0x1fc   :  { %v755_v23 = vmul.f32 1.442695, %v704_v17  ;;  %1585 = vst [vmem:[%s3713_s10 + $0xa0] sm:$0xff] %v3186_v62  ;;  %v585_v25 = vadd.f32 %v584_v22, %v2827_v10  ;;  %2057 = vmatprep.mubr.f32.mxu0 %v827_v19  ;;  %1643 = vst [vmem:[%s3717_s12 + $0x70] sm:$0xff] %v827_v19  ;;  %v796_v26 = vmul.f32 %v2228_v21, %v668_v8 }
 0x1fd   :  { %v588_v27 = vpop.f32.mrf.mxu1 }
 0x1fe   :  { %2235 = vpow2.f32 %v755_v23  ;;  %v705_v28 = vmul.f32 0.5, %v585_v25  ;;  %1617 = vst [vmem:[%s3714_s11 + $0xa0] sm:$0xff] %v585_v25  ;;  %v3204_v18 = vadd.f32 %v588_v27, %v2825_v9  ;;  %v828_v30 = vadd.f32 %v796_v26, %v3096_v31  ;;  %v670_v31 = vld [vmem:[%s3715_s9 + $0x88] sm:$0xff] }
 0x1ff   :  { %v2230_v29 = vpop.eup %2229  ;;  %v590_v32 = vpop.f32.mrf.mxu1 }
 0x200   :  { %v757_v33 = vmul.f32 1.442695, %v705_v28  ;;  %1586 = vst [vmem:[%s3713_s10 + $0xa8] sm:$0xff] %v3204_v18  ;;  %v591_v34 = vadd.f32 %v590_v32, %v2827_v10  ;;  %2058 = vmatmul.mubr.f32.gmra.mxu0 %v828_v30  ;;  %1644 = vst [vmem:[%s3717_s12 + $0x78] sm:$0xff] %v828_v30  ;;  %v797_v36 = vmul.f32 %v2230_v29, %v669_v20 }
 0x201   :  { %v594_v38 = vpop.f32.mrf.mxu1 }
 0x202   :  { %2237 = vpow2.f32 %v757_v33  ;;  %v706_v39 = vmul.f32 0.5, %v591_v34  ;;  %1618 = vst [vmem:[%s3714_s11 + $0xa8] sm:$0xff] %v591_v34  ;;  %v3222_v24 = vadd.f32 %v594_v38, %v2825_v9  ;;  %v829_v40 = vadd.f32 %v797_v36, %v3114_v41  ;;  %v671_v41 = vld [vmem:[%s3715_s9 + $0x90] sm:$0xff] }
 0x203   :  { %v2232_v43 = vpop.eup %2231  ;;  %v596_v44 = vpop.f32.mrf.mxu1 }
 0x204   :  { %v759_v35 = vmul.f32 1.442695, %v706_v39  ;;  %1587 = vst [vmem:[%s3713_s10 + $0xb0] sm:$0xff] %v3222_v24  ;;  %v597_v45 = vadd.f32 %v596_v44, %v2827_v10  ;;  %2060 = vmatprep.mubr.f32.mxu0 %v829_v40  ;;  %1645 = vst [vmem:[%s3717_s12 + $0x80] sm:$0xff] %v829_v40  ;;  %v798_v46 = vmul.f32 %v2232_v43, %v670_v31 }
 0x205   :  { %v600_v47 = vpop.f32.mrf.mxu1 }
 0x206   :  { %2239 = vpow2.f32 %v759_v35  ;;  %v707_v48 = vmul.f32 0.5, %v597_v45  ;;  %1619 = vst [vmem:[%s3714_s11 + $0xb0] sm:$0xff] %v597_v45  ;;  %v3240_v37 = vadd.f32 %v600_v47, %v2825_v9  ;;  %v830_v50 = vadd.f32 %v798_v46, %v3132_v51 }
 0x207   :  { %v2234_v53 = vpop.eup %2233  ;;  %v602_v54 = vpop.f32.mrf.mxu1 }
 0x208   :  { %v761_v56 = vmul.f32 1.442695, %v707_v48  ;;  %1588 = vst [vmem:[%s3713_s10 + $0xb8] sm:$0xff] %v3240_v37  ;;  %v603_v42 = vadd.f32 %v602_v54, %v2827_v10  ;;  %2061 = vmatmul.mubr.f32.gmra.mxu0 %v830_v50  ;;  %1646 = vst [vmem:[%s3717_s12 + $0x88] sm:$0xff] %v830_v50  ;;  %v799_v51 = vmul.f32 %v2234_v53, %v671_v41 }
 0x209   :  { %v606_v57 = vpop.f32.mrf.mxu1 }
 0x20a   :  { %2241 = vpow2.f32 %v761_v56  ;;  %v708_v59 = vmul.f32 0.5, %v603_v42  ;;  %1620 = vst [vmem:[%s3714_s11 + $0xb8] sm:$0xff] %v603_v42  ;;  %v3264_v63 = vadd.f32 %v606_v57, %v2825_v9  ;;  %v831_v0 = vadd.f32 %v799_v51, %v3150_v60 }
 0x20b   :  { %v2236_v1 = vpop.eup %2235  ;;  %v608_v2 = vpop.f32.mrf.mxu1 }
 0x20c   :  { %v763_v4 = vmul.f32 1.442695, %v708_v59  ;;  %1589 = vst [vmem:[%s3713_s10 + $0xc0] sm:$0xff] %v3264_v63  ;;  %v609_v52 = vadd.f32 %v608_v2, %v2827_v10  ;;  %2063 = vmatprep.mubr.f32.mxu0 %v831_v0  ;;  %1647 = vst [vmem:[%s3717_s12 + $0x90] sm:$0xff] %v831_v0  ;;  %v800_v60 = vmul.f32 %v2236_v1, %v672_v58 }
 0x20d   :  { %v612_v61 = vpop.f32.mrf.mxu1 }
 0x20e   :  { %2243 = vpow2.f32 %v763_v4  ;;  %v709_v11 = vmul.f32 0.5, %v609_v52  ;;  %1621 = vst [vmem:[%s3714_s11 + $0xc0] sm:$0xff] %v609_v52  ;;  %v3288_v12 = vadd.f32 %v612_v61, %v2825_v9  ;;  %v832_v16 = vadd.f32 %v800_v60, %v3168_v6  ;;  %v674_v6 = vld [vmem:[%s3715_s9 + $0xa8] sm:$0xff] }
 0x20f   :  { %v2238_v13 = vpop.eup %2237  ;;  %v614_v14 = vpop.f32.mrf.mxu1 }
 0x210   :  { %v765_v15 = vmul.f32 1.442695, %v709_v11  ;;  %1590 = vst [vmem:[%s3713_s10 + $0xc8] sm:$0xff] %v3288_v12  ;;  %v615_v8 = vadd.f32 %v614_v14, %v2827_v10  ;;  %2064 = vmatmul.mubr.f32.gmra.mxu0 %v832_v16  ;;  %1648 = vst [vmem:[%s3717_s12 + $0x98] sm:$0xff] %v832_v16  ;;  %v801_v17 = vmul.f32 %v2238_v13, %v673_v5 }
 0x211   :  { %v618_v19 = vpop.f32.mrf.mxu1 }
 0x212   :  { %2245 = vpow2.f32 %v765_v15  ;;  %v710_v21 = vmul.f32 0.5, %v615_v8  ;;  %1622 = vst [vmem:[%s3714_s11 + $0xc8] sm:$0xff] %v615_v8  ;;  %v3306_v22 = vadd.f32 %v618_v19, %v2825_v9  ;;  %v833_v23 = vadd.f32 %v801_v17, %v3186_v62  ;;  %v675_v62 = vld [vmem:[%s3715_s9 + $0xb0] sm:$0xff] }
 0x213   :  { %v2240_v25 = vpop.eup %2239  ;;  %v620_v26 = vpop.f32.mrf.mxu1 }
 0x214   :  { %v767_v27 = vmul.f32 1.442695, %v710_v21  ;;  %1591 = vst [vmem:[%s3713_s10 + $0xd0] sm:$0xff] %v3306_v22  ;;  %v621_v20 = vadd.f32 %v620_v26, %v2827_v10  ;;  %2066 = vmatprep.mubr.f32.mxu0 %v833_v23  ;;  %1649 = vst [vmem:[%s3717_s12 + $0xa0] sm:$0xff] %v833_v23  ;;  %v802_v28 = vmul.f32 %v2240_v25, %v674_v6  ;;  %v681_v21 = vld [vmem:[%s3715_s9 + $0xe0] sm:$0xff]  ;;  %v682_v26 = vld [vmem:[%s3715_s9 + $0xe8] sm:$0xff] }
 0x215   :  { %v624_v30 = vpop.f32.mrf.mxu1 }
 0x216   :  { %2247 = vpow2.f32 %v767_v27  ;;  %v711_v29 = vmul.f32 0.5, %v621_v20  ;;  %1623 = vst [vmem:[%s3714_s11 + $0xd0] sm:$0xff] %v621_v20  ;;  %v3324_v32 = vadd.f32 %v624_v30, %v2825_v9  ;;  %v834_v33 = vadd.f32 %v802_v28, %v3204_v18  ;;  %v676_v18 = vld [vmem:[%s3715_s9 + $0xb8] sm:$0xff]  ;;  %v683_v30 = vld [vmem:[%s3715_s9 + $0xf0] sm:$0xff] }
 0x217   :  { %v2242_v34 = vpop.eup %2241  ;;  %v626_v36 = vpop.f32.mrf.mxu1 }
 0x218   :  { %v769_v38 = vmul.f32 1.442695, %v711_v29  ;;  %1592 = vst [vmem:[%s3713_s10 + $0xd8] sm:$0xff] %v3324_v32  ;;  %v627_v31 = vadd.f32 %v626_v36, %v2827_v10  ;;  %2067 = vmatmul.mubr.f32.gmra.mxu0 %v834_v33  ;;  %1650 = vst [vmem:[%s3717_s12 + $0xa8] sm:$0xff] %v834_v33  ;;  %v803_v39 = vmul.f32 %v2242_v34, %v675_v62  ;;  %v684_v33 = vld [vmem:[%s3715_s9 + $0xf8] sm:$0xff] }
 0x219   :  { %v630_v40 = vpop.f32.mrf.mxu1 }
 0x21a   :  { %2249 = vpow2.f32 %v769_v38  ;;  %v712_v43 = vmul.f32 0.5, %v627_v31  ;;  %1624 = vst [vmem:[%s3714_s11 + $0xd8] sm:$0xff] %v627_v31  ;;  %v3342_v44 = vadd.f32 %v630_v40, %v2825_v9  ;;  %v835_v35 = vadd.f32 %v803_v39, %v3222_v24  ;;  %v677_v24 = vld [vmem:[%s3715_s9 + $0xc0] sm:$0xff] }
 0x21b   :  { %v2244_v45 = vpop.eup %2243  ;;  %v632_v46 = vpop.f32.mrf.mxu1  ;;  %v3444_v39 = vld [vmem:[%s3718_s6] ss:$0 sm:$0xff] }
 0x21c   :  { %v771_v47 = vmul.f32 1.442695, %v712_v43  ;;  %1593 = vst [vmem:[%s3713_s10 + $0xe0] sm:$0xff] %v3342_v44  ;;  %v633_v41 = vadd.f32 %v632_v46, %v2827_v10  ;;  %2069 = vmatprep.mubr.f32.mxu0 %v835_v35  ;;  %1651 = vst [vmem:[%s3717_s12 + $0xb0] sm:$0xff] %v835_v35  ;;  %v804_v48 = vmul.f32 %v2244_v45, %v676_v18 }
 0x21d   :  { %v636_v50 = vpop.f32.mrf.mxu1 }
 0x21e   :  { %2251 = vpow2.f32 %v771_v47  ;;  %v713_v53 = vmul.f32 0.5, %v633_v41  ;;  %1625 = vst [vmem:[%s3714_s11 + $0xe0] sm:$0xff] %v633_v41  ;;  %v3360_v54 = vadd.f32 %v636_v50, %v2825_v9  ;;  %v836_v55 = vadd.f32 %v804_v48, %v3240_v37  ;;  %v678_v37 = vld [vmem:[%s3715_s9 + $0xc8] sm:$0xff] }
 0x21f   :  { %v2246_v56 = vpop.eup %2245  ;;  %v638_v42 = vpop.f32.mrf.mxu1 }
 0x220   :  { %v773_v51 = vmul.f32 1.442695, %v713_v53  ;;  %1594 = vst [vmem:[%s3713_s10 + $0xe8] sm:$0xff] %v3360_v54  ;;  %v639_v57 = vadd.f32 %v638_v42, %v2827_v10  ;;  %2070 = vmatmul.mubr.f32.gmra.mxu0 %v836_v55  ;;  %1652 = vst [vmem:[%s3717_s12 + $0xb8] sm:$0xff] %v836_v55  ;;  %v805_v58 = vmul.f32 %v2246_v56, %v677_v24 }
 0x221   :  { %v642_v49 = vpop.f32.mrf.mxu1 }
 0x222   :  { %2253 = vpow2.f32 %v773_v51  ;;  %v714_v59 = vmul.f32 0.5, %v639_v57  ;;  %1626 = vst [vmem:[%s3714_s11 + $0xe8] sm:$0xff] %v639_v57  ;;  %v643_v0 = vadd.f32 %v642_v49, %v2825_v9  ;;  %v837_v1 = vadd.f32 %v805_v58, %v3264_v63  ;;  %v679_v63 = vld [vmem:[%s3715_s9 + $0xd0] sm:$0xff] }
 0x223   :  { %v2248_v2 = vpop.eup %2247  ;;  %v644_v3 = vpop.f32.mrf.mxu1 }
 0x224   :  { %v775_v4 = vmul.f32 1.442695, %v714_v59  ;;  %1595 = vst [vmem:[%s3713_s10 + $0xf0] sm:$0xff] %v643_v0  ;;  %v645_v52 = vadd.f32 %v644_v3, %v2827_v10  ;;  %2072 = vmatprep.mubr.f32.mxu0 %v837_v1  ;;  %1653 = vst [vmem:[%s3717_s12 + $0xc0] sm:$0xff] %v837_v1  ;;  %v806_v60 = vmul.f32 %v2248_v2, %v678_v37 }
 0x225   :  { %v648_v61 = vpop.f32.mrf.mxu1 }
 0x226   :  { %2255 = vpow2.f32 %v775_v4  ;;  %v715_v5 = vmul.f32 0.5, %v645_v52  ;;  %1627 = vst [vmem:[%s3714_s11 + $0xf0] sm:$0xff] %v645_v52  ;;  %v649_v7 = vadd.f32 %v648_v61, %v2825_v9  ;;  %v838_v11 = vadd.f32 %v806_v60, %v3288_v12  ;;  %v680_v9 = vld [vmem:[%s3715_s9 + $0xd8] sm:$0xff] }
 0x227   :  { %v2250_v16 = vpop.eup %2249  ;;  %v650_v13 = vpop.f32.mrf.mxu1 }
 0x228   :  { %v777_v14 = vmul.f32 1.442695, %v715_v5  ;;  %1596 = vst [vmem:[%s3713_s10 + $0xf8] sm:$0xff] %v649_v7  ;;  %v651_v15 = vadd.f32 %v650_v13, %v2827_v10  ;;  %2073 = vmatmul.mubr.f32.gmra.mxu0 %v838_v11  ;;  %1654 = vst [vmem:[%s3717_s12 + $0xc8] sm:$0xff] %v838_v11  ;;  %v807_v8 = vmul.f32 %v2250_v16, %v679_v63 }
 0x22a   :  { %2257 = vpow2.f32 %v777_v14  ;;  %v716_v12 = vmul.f32 0.5, %v651_v15  ;;  %1628 = vst [vmem:[%s3714_s11 + $0xf8] sm:$0xff] %v651_v15  ;;  %v839_v17 = vadd.f32 %v807_v8, %v3306_v22 }
 0x22b   :  { %v2252_v19 = vpop.eup %2251 }
 0x22c   :  { %v779_v10 = vmul.f32 1.442695, %v716_v12  ;;  %2075 = vmatprep.mubr.f32.mxu0 %v839_v17  ;;  %1655 = vst [vmem:[%s3717_s12 + $0xd0] sm:$0xff] %v839_v17  ;;  %v808_v6 = vmul.f32 %v2252_v19, %v680_v9 }
 0x22e   :  { %2259 = vpow2.f32 %v779_v10  ;;  %v840_v23 = vadd.f32 %v808_v6, %v3324_v32 }
 0x22f   :  { %v2254_v25 = vpop.eup %2253 }
 0x230   :  { %2076 = vmatmul.mubr.f32.gmra.mxu0 %v840_v23  ;;  %1656 = vst [vmem:[%s3717_s12 + $0xd8] sm:$0xff] %v840_v23  ;;  %v809_v22 = vmul.f32 %v2254_v25, %v681_v21 }
 0x232   :  { %v841_v27 = vadd.f32 %v809_v22, %v3342_v44 }
 0x233   :  { %v2256_v20 = vpop.eup %2255 }
 0x234   :  { %2078 = vmatprep.mubr.f32.mxu0 %v841_v27  ;;  %1657 = vst [vmem:[%s3717_s12 + $0xe0] sm:$0xff] %v841_v27  ;;  %v810_v28 = vmul.f32 %v2256_v20, %v682_v26 }
 0x236   :  { %v842_v62 = vadd.f32 %v810_v28, %v3360_v54 }
 0x237   :  { %v2258_v29 = vpop.eup %2257 }
 0x238   :  { %2079 = vmatmul.mubr.f32.gmra.mxu0 %v842_v62  ;;  %1658 = vst [vmem:[%s3717_s12 + $0xe8] sm:$0xff] %v842_v62  ;;  %v811_v32 = vmul.f32 %v2258_v29, %v683_v30 }
 0x23a   :  { %v843_v34 = vadd.f32 %v811_v32, %v643_v0 }
 0x23b   :  { %v2260_v36 = vpop.eup %2259 }
 0x23c   :  { %2081 = vmatprep.mubr.f32.mxu0 %v843_v34  ;;  %1659 = vst [vmem:[%s3717_s12 + $0xf0] sm:$0xff] %v843_v34  ;;  %v812_v38 = vmul.f32 %v2260_v36, %v684_v33 }
 0x23e   :  { %v844_v31 = vadd.f32 %v812_v38, %v649_v7 }
 0x240   :  { %2082 = vmatmul.mubr.f32.gmra.mxu0 %v844_v31  ;;  %1660 = vst [vmem:[%s3717_s12 + $0xf8] sm:$0xff] %v844_v31 }
 0x288   :  { %v2038_v40 = vpop.f32.mrf.mxu0 }
 0x289   :  { %v940_v18 = vadd.f32 %v2038_v40, %v3444_v39 }
 0x28a   :  { %v934_v43 = vpop.f32.mrf.mxu0 }
 0x28b   :  { %v1094_v44 = vmax.f32 %v940_v18, 0.0  ;;  %v935_v35 = vadd.f32 %v3444_v39, %v934_v43 }
 0x28d   :  { %1662 = vst [vmem:[%s3719_s13 + $0x8] sm:$0xff] %v1094_v44  ;;  %v1093_v45 = vmax.f32 %v935_v35, 0.0 }
 0x28f   :  { %1661 = vst [vmem:[%s3719_s13] sm:$0xff] %v1093_v45  ;;  %2116 = vmatprep.mubr.f32.mxu0 %v1093_v45 }
 0x290   :  { %v2041_v46 = vpop.f32.mrf.mxu0  ;;  %2117 = vmatmul.mubr.f32.vlgmr.msra.gmra.mxu0 %v1094_v44 }
 0x291   :  { %v950_v47 = vadd.f32 %v2041_v46, %v3444_v39 }
 0x292   :  { %v944_v41 = vpop.f32.mrf.mxu0 }
 0x293   :  { %v1096_v48 = vmax.f32 %v950_v47, 0.0  ;;  %v945_v50 = vadd.f32 %v3444_v39, %v944_v41 }
 0x295   :  { %1664 = vst [vmem:[%s3719_s13 + $0x18] sm:$0xff] %v1096_v48  ;;  %v1095_v24 = vmax.f32 %v945_v50, 0.0 }
 0x297   :  { %1663 = vst [vmem:[%s3719_s13 + $0x10] sm:$0xff] %v1095_v24  ;;  %2119 = vmatprep.mubr.f32.mxu0 %v1095_v24 }
 0x298   :  { %v2044_v53 = vpop.f32.mrf.mxu0  ;;  %2120 = vmatmul.mubr.f32.gmra.mxu0 %v1096_v48 }
 0x299   :  { %v960_v54 = vadd.f32 %v2044_v53, %v3444_v39 }
 0x29a   :  { %v954_v55 = vpop.f32.mrf.mxu0 }
 0x29b   :  { %v1098_v56 = vmax.f32 %v960_v54, 0.0  ;;  %v955_v42 = vadd.f32 %v3444_v39, %v954_v55 }
 0x29d   :  { %1666 = vst [vmem:[%s3719_s13 + $0x28] sm:$0xff] %v1098_v56  ;;  %v1097_v51 = vmax.f32 %v955_v42, 0.0 }
 0x29f   :  { %1665 = vst [vmem:[%s3719_s13 + $0x20] sm:$0xff] %v1097_v51  ;;  %2122 = vmatprep.mubr.f32.mxu0 %v1097_v51 }
 0x2a0   :  { %v2047_v57 = vpop.f32.mrf.mxu0  ;;  %2123 = vmatmul.mubr.f32.gmra.mxu0 %v1098_v56 }
 0x2a1   :  { %v970_v58 = vadd.f32 %v2047_v57, %v3444_v39 }
 0x2a2   :  { %v964_v49 = vpop.f32.mrf.mxu0 }
 0x2a3   :  { %v1100_v37 = vmax.f32 %v970_v58, 0.0  ;;  %v965_v59 = vadd.f32 %v3444_v39, %v964_v49 }
 0x2a5   :  { %1668 = vst [vmem:[%s3719_s13 + $0x38] sm:$0xff] %v1100_v37  ;;  %v1099_v0 = vmax.f32 %v965_v59, 0.0 }
 0x2a7   :  { %1667 = vst [vmem:[%s3719_s13 + $0x30] sm:$0xff] %v1099_v0  ;;  %2125 = vmatprep.mubr.f32.mxu0 %v1099_v0 }
 0x2a8   :  { %v2050_v1 = vpop.f32.mrf.mxu0  ;;  %2126 = vmatmul.mubr.f32.gmra.mxu0 %v1100_v37 }
 0x2a9   :  { %v980_v2 = vadd.f32 %v2050_v1, %v3444_v39 }
 0x2aa   :  { %v974_v3 = vpop.f32.mrf.mxu0 }
 0x2ab   :  { %v1102_v4 = vmax.f32 %v980_v2, 0.0  ;;  %v975_v52 = vadd.f32 %v3444_v39, %v974_v3 }
 0x2ad   :  { %1670 = vst [vmem:[%s3719_s13 + $0x48] sm:$0xff] %v1102_v4  ;;  %v1101_v60 = vmax.f32 %v975_v52, 0.0 }
 0x2af   :  { %1669 = vst [vmem:[%s3719_s13 + $0x40] sm:$0xff] %v1101_v60  ;;  %2128 = vmatprep.mubr.f32.mxu0 %v1101_v60 }
 0x2b0   :  { %v2053_v61 = vpop.f32.mrf.mxu0  ;;  %2129 = vmatmul.mubr.f32.gmra.mxu0 %v1102_v4 }
 0x2b1   :  { %v990_v63 = vadd.f32 %v2053_v61, %v3444_v39 }
 0x2b2   :  { %v984_v5 = vpop.f32.mrf.mxu0 }
 0x2b3   :  { %v1104_v7 = vmax.f32 %v990_v63, 0.0  ;;  %v985_v11 = vadd.f32 %v3444_v39, %v984_v5 }
 0x2b5   :  { %1672 = vst [vmem:[%s3719_s13 + $0x58] sm:$0xff] %v1104_v7  ;;  %v1103_v16 = vmax.f32 %v985_v11, 0.0 }
 0x2b7   :  { %1671 = vst [vmem:[%s3719_s13 + $0x50] sm:$0xff] %v1103_v16  ;;  %2131 = vmatprep.mubr.f32.mxu0 %v1103_v16 }
 0x2b8   :  { %v2056_v13 = vpop.f32.mrf.mxu0  ;;  %2132 = vmatmul.mubr.f32.gmra.mxu0 %v1104_v7  ;;  %v3577_v7 = vld [vmem:[%s3720_s8] ss:$0 sm:$0xff] }
 0x2b9   :  { %v1000_v14 = vadd.f32 %v2056_v13, %v3444_v39 }
 0x2ba   :  { %v994_v15 = vpop.f32.mrf.mxu0 }
 0x2bb   :  { %v1106_v8 = vmax.f32 %v1000_v14, 0.0  ;;  %v995_v9 = vadd.f32 %v3444_v39, %v994_v15 }
 0x2bd   :  { %1674 = vst [vmem:[%s3719_s13 + $0x68] sm:$0xff] %v1106_v8  ;;  %v1105_v12 = vmax.f32 %v995_v9, 0.0 }
 0x2bf   :  { %1673 = vst [vmem:[%s3719_s13 + $0x60] sm:$0xff] %v1105_v12  ;;  %2134 = vmatprep.mubr.f32.mxu0 %v1105_v12 }
 0x2c0   :  { %v2059_v17 = vpop.f32.mrf.mxu0  ;;  %2135 = vmatmul.mubr.f32.gmra.mxu0 %v1106_v8 }
 0x2c1   :  { %v1010_v19 = vadd.f32 %v2059_v17, %v3444_v39 }
 0x2c2   :  { %v1004_v10 = vpop.f32.mrf.mxu0 }
 0x2c3   :  { %v1108_v6 = vmax.f32 %v1010_v19, 0.0  ;;  %v1005_v21 = vadd.f32 %v3444_v39, %v1004_v10 }
 0x2c5   :  { %1676 = vst [vmem:[%s3719_s13 + $0x78] sm:$0xff] %v1108_v6  ;;  %v1107_v23 = vmax.f32 %v1005_v21, 0.0 }
 0x2c7   :  { %1675 = vst [vmem:[%s3719_s13 + $0x70] sm:$0xff] %v1107_v23  ;;  %2137 = vmatprep.mubr.f32.mxu0 %v1107_v23 }
 0x2c8   :  { %v2062_v25 = vpop.f32.mrf.mxu0  ;;  %2138 = vmatmul.mubr.f32.gmra.mxu0 %v1108_v6 }
 0x2c9   :  { %v1020_v22 = vadd.f32 %v2062_v25, %v3444_v39 }
 0x2ca   :  { %v1014_v26 = vpop.f32.mrf.mxu0 }
 0x2cb   :  { %v1110_v27 = vmax.f32 %v1020_v22, 0.0  ;;  %v1015_v20 = vadd.f32 %v3444_v39, %v1014_v26 }
 0x2cd   :  { %1678 = vst [vmem:[%s3719_s13 + $0x88] sm:$0xff] %v1110_v27  ;;  %v1109_v28 = vmax.f32 %v1015_v20, 0.0 }
 0x2cf   :  { %1677 = vst [vmem:[%s3719_s13 + $0x80] sm:$0xff] %v1109_v28  ;;  %2140 = vmatprep.mubr.f32.mxu0 %v1109_v28 }
 0x2d0   :  { %v2065_v30 = vpop.f32.mrf.mxu0  ;;  %2141 = vmatmul.mubr.f32.gmra.mxu0 %v1110_v27 }
 0x2d1   :  { %v1030_v62 = vadd.f32 %v2065_v30, %v3444_v39 }
 0x2d2   :  { %v1024_v29 = vpop.f32.mrf.mxu0 }
 0x2d3   :  { %v1112_v32 = vmax.f32 %v1030_v62, 0.0  ;;  %v1025_v33 = vadd.f32 %v3444_v39, %v1024_v29 }
 0x2d5   :  { %1680 = vst [vmem:[%s3719_s13 + $0x98] sm:$0xff] %v1112_v32  ;;  %v1111_v34 = vmax.f32 %v1025_v33, 0.0 }
 0x2d7   :  { %1679 = vst [vmem:[%s3719_s13 + $0x90] sm:$0xff] %v1111_v34  ;;  %2143 = vmatprep.mubr.f32.mxu0 %v1111_v34 }
 0x2d8   :  { %v2068_v36 = vpop.f32.mrf.mxu0  ;;  %2144 = vmatmul.mubr.f32.gmra.mxu0 %v1112_v32 }
 0x2d9   :  { %v1040_v38 = vadd.f32 %v2068_v36, %v3444_v39 }
 0x2da   :  { %v1034_v31 = vpop.f32.mrf.mxu0 }
 0x2db   :  { %v1114_v40 = vmax.f32 %v1040_v38, 0.0  ;;  %v1035_v18 = vadd.f32 %v3444_v39, %v1034_v31 }
 0x2dd   :  { %1682 = vst [vmem:[%s3719_s13 + $0xa8] sm:$0xff] %v1114_v40  ;;  %v1113_v43 = vmax.f32 %v1035_v18, 0.0 }
 0x2df   :  { %1681 = vst [vmem:[%s3719_s13 + $0xa0] sm:$0xff] %v1113_v43  ;;  %2146 = vmatprep.mubr.f32.mxu0 %v1113_v43 }
 0x2e0   :  { %v2071_v44 = vpop.f32.mrf.mxu0  ;;  %2147 = vmatmul.mubr.f32.gmra.mxu0 %v1114_v40 }
 0x2e1   :  { %v1050_v35 = vadd.f32 %v2071_v44, %v3444_v39 }
 0x2e2   :  { %v1044_v45 = vpop.f32.mrf.mxu0 }
 0x2e3   :  { %v1116_v46 = vmax.f32 %v1050_v35, 0.0  ;;  %v1045_v47 = vadd.f32 %v3444_v39, %v1044_v45 }
 0x2e5   :  { %1684 = vst [vmem:[%s3719_s13 + $0xb8] sm:$0xff] %v1116_v46  ;;  %v1115_v41 = vmax.f32 %v1045_v47, 0.0 }
 0x2e7   :  { %1683 = vst [vmem:[%s3719_s13 + $0xb0] sm:$0xff] %v1115_v41  ;;  %2149 = vmatprep.mubr.f32.mxu0 %v1115_v41 }
 0x2e8   :  { %v2074_v48 = vpop.f32.mrf.mxu0  ;;  %2150 = vmatmul.mubr.f32.gmra.mxu0 %v1116_v46 }
 0x2e9   :  { %v1060_v50 = vadd.f32 %v2074_v48, %v3444_v39 }
 0x2ea   :  { %v1054_v24 = vpop.f32.mrf.mxu0 }
 0x2eb   :  { %v1118_v53 = vmax.f32 %v1060_v50, 0.0  ;;  %v1055_v54 = vadd.f32 %v3444_v39, %v1054_v24 }
 0x2ed   :  { %1686 = vst [vmem:[%s3719_s13 + $0xc8] sm:$0xff] %v1118_v53  ;;  %v1117_v55 = vmax.f32 %v1055_v54, 0.0 }
 0x2ef   :  { %1685 = vst [vmem:[%s3719_s13 + $0xc0] sm:$0xff] %v1117_v55  ;;  %2152 = vmatprep.mubr.f32.mxu0 %v1117_v55 }
 0x2f0   :  { %v2077_v56 = vpop.f32.mrf.mxu0  ;;  %2153 = vmatmul.mubr.f32.gmra.mxu0 %v1118_v53 }
 0x2f1   :  { %v1070_v42 = vadd.f32 %v2077_v56, %v3444_v39 }
 0x2f2   :  { %v1064_v51 = vpop.f32.mrf.mxu0 }
 0x2f3   :  { %v1120_v57 = vmax.f32 %v1070_v42, 0.0  ;;  %v1065_v58 = vadd.f32 %v3444_v39, %v1064_v51 }
 0x2f5   :  { %1688 = vst [vmem:[%s3719_s13 + $0xd8] sm:$0xff] %v1120_v57  ;;  %v1119_v49 = vmax.f32 %v1065_v58, 0.0 }
 0x2f7   :  { %1687 = vst [vmem:[%s3719_s13 + $0xd0] sm:$0xff] %v1119_v49  ;;  %2155 = vmatprep.mubr.f32.mxu0 %v1119_v49 }
 0x2f8   :  { %v2080_v37 = vpop.f32.mrf.mxu0  ;;  %2156 = vmatmul.mubr.f32.gmra.mxu0 %v1120_v57 }
 0x2f9   :  { %v1080_v59 = vadd.f32 %v2080_v37, %v3444_v39 }
 0x2fa   :  { %v1074_v0 = vpop.f32.mrf.mxu0 }
 0x2fb   :  { %v1122_v1 = vmax.f32 %v1080_v59, 0.0  ;;  %v1075_v2 = vadd.f32 %v3444_v39, %v1074_v0 }
 0x2fd   :  { %1690 = vst [vmem:[%s3719_s13 + $0xe8] sm:$0xff] %v1122_v1  ;;  %v1121_v3 = vmax.f32 %v1075_v2, 0.0 }
 0x2ff   :  { %1689 = vst [vmem:[%s3719_s13 + $0xe0] sm:$0xff] %v1121_v3  ;;  %2158 = vmatprep.mubr.f32.mxu0 %v1121_v3 }
 0x300   :  { %v2083_v4 = vpop.f32.mrf.mxu0  ;;  %2159 = vmatmul.mubr.f32.gmra.mxu0 %v1122_v1 }
 0x301   :  { %v1090_v52 = vadd.f32 %v2083_v4, %v3444_v39 }
 0x302   :  { %v1084_v60 = vpop.f32.mrf.mxu0 }
 0x303   :  { %v1124_v61 = vmax.f32 %v1090_v52, 0.0  ;;  %v1085_v63 = vadd.f32 %v3444_v39, %v1084_v60 }
 0x305   :  { %1692 = vst [vmem:[%s3719_s13 + $0xf8] sm:$0xff] %v1124_v61  ;;  %v1123_v5 = vmax.f32 %v1085_v63, 0.0 }
 0x307   :  { %1691 = vst [vmem:[%s3719_s13 + $0xf0] sm:$0xff] %v1123_v5  ;;  %2161 = vmatprep.mubr.f32.mxu0 %v1123_v5 }
 0x308   :  { %2162 = vmatmul.mubr.f32.gmra.mxu0 %v1124_v61 }
 0x350   :  { %v2118_v11 = vpop.f32.mrf.mxu0 }
 0x351   :  { %v1220_v16 = vadd.f32 %v2118_v11, %v3577_v7 }
 0x352   :  { %v1214_v39 = vpop.f32.mrf.mxu0 }
 0x353   :  { %v1749_v13 = vmul.f32 -1.442695, %v1220_v16  ;;  %v1215_v14 = vadd.f32 %v3577_v7, %v1214_v39 }
 0x355   :  { %2261 = vpow2.f32 %v1749_v13  ;;  %v1748_v15 = vmul.f32 -1.442695, %v1215_v14 }
 0x357   :  { %2263 = vpow2.f32 %v1748_v15 }
 0x358   :  { %v2121_v8 = vpop.f32.mrf.mxu0 }
 0x359   :  { %v1230_v9 = vadd.f32 %v2121_v8, %v3577_v7 }
 0x35a   :  { %v1224_v12 = vpop.f32.mrf.mxu0 }
 0x35b   :  { %v1751_v17 = vmul.f32 -1.442695, %v1230_v9  ;;  %v1225_v19 = vadd.f32 %v3577_v7, %v1224_v12 }
 0x35d   :  { %2265 = vpow2.f32 %v1751_v17  ;;  %v1750_v10 = vmul.f32 -1.442695, %v1225_v19 }
 0x35f   :  { %2267 = vpow2.f32 %v1750_v10 }
 0x360   :  { %v2124_v6 = vpop.f32.mrf.mxu0 }
 0x361   :  { %v1240_v21 = vadd.f32 %v2124_v6, %v3577_v7 }
 0x362   :  { %v2262_v23 = vpop.eup %2261  ;;  %v1234_v25 = vpop.f32.mrf.mxu0 }
 0x363   :  { %v1470_v22 = vadd.f32 1.0, %v2262_v23  ;;  %v1753_v26 = vmul.f32 -1.442695, %v1240_v21  ;;  %v1235_v27 = vadd.f32 %v3577_v7, %v1234_v25 }
 0x364   :  { %v2264_v20 = vpop.eup %2263 }
 0x365   :  { %2269 = vrcp.f32 %v1470_v22  ;;  %v1469_v28 = vadd.f32 1.0, %v2264_v20  ;;  %v1752_v30 = vmul.f32 -1.442695, %v1235_v27 }
 0x366   :  { %2271 = vpow2.f32 %v1753_v26 }
 0x367   :  { %2273 = vrcp.f32 %v1469_v28 }
 0x368   :  { %2275 = vpow2.f32 %v1752_v30  ;;  %v2127_v62 = vpop.f32.mrf.mxu0 }
 0x369   :  { %v1250_v29 = vadd.f32 %v2127_v62, %v3577_v7 }
 0x36a   :  { %v2266_v32 = vpop.eup %2265  ;;  %v1244_v33 = vpop.f32.mrf.mxu0 }
 0x36b   :  { %v1472_v34 = vadd.f32 1.0, %v2266_v32  ;;  %v1755_v36 = vmul.f32 -1.442695, %v1250_v29  ;;  %v1245_v38 = vadd.f32 %v3577_v7, %v1244_v33 }
 0x36c   :  { %v2268_v31 = vpop.eup %2267 }
 0x36d   :  { %2277 = vrcp.f32 %v1472_v34  ;;  %v1471_v40 = vadd.f32 1.0, %v2268_v31  ;;  %v1754_v18 = vmul.f32 -1.442695, %v1245_v38 }
 0x36e   :  { %2279 = vpow2.f32 %v1755_v36 }
 0x36f   :  { %2281 = vrcp.f32 %v1471_v40 }
 0x370   :  { %2283 = vpow2.f32 %v1754_v18  ;;  %v2130_v43 = vpop.f32.mrf.mxu0 }
 0x371   :  { %v1260_v44 = vadd.f32 %v2130_v43, %v3577_v7 }
 0x372   :  { %v2270_v35 = vpop.eup %2269  ;;  %v1254_v45 = vpop.f32.mrf.mxu0 }
 0x373   :  { %v2272_v46 = vpop.eup %2271  ;;  %1694 = vst [vmem:[%s3721_s14 + $0x8] sm:$0xff] %v2270_v35  ;;  %v1757_v47 = vmul.f32 -1.442695, %v1260_v44  ;;  %v1255_v41 = vadd.f32 %v3577_v7, %v1254_v45 }
 0x374   :  { %v2274_v48 = vpop.eup %2273  ;;  %v1474_v50 = vadd.f32 1.0, %v2272_v46 }
 0x375   :  { %v2276_v24 = vpop.eup %2275  ;;  %1693 = vst [vmem:[%s3721_s14] sm:$0xff] %v2274_v48  ;;  %2285 = vpow2.f32 %v1757_v47  ;;  %v1756_v53 = vmul.f32 -1.442695, %v1255_v41 }
 0x376   :  { %2287 = vrcp.f32 %v1474_v50  ;;  %v1473_v54 = vadd.f32 1.0, %v2276_v24 }
 0x377   :  { %2289 = vpow2.f32 %v1756_v53 }
 0x378   :  { %2291 = vrcp.f32 %v1473_v54  ;;  %v2133_v55 = vpop.f32.mrf.mxu0 }
 0x379   :  { %v1270_v56 = vadd.f32 %v2133_v55, %v3577_v7 }
 0x37a   :  { %v2278_v42 = vpop.eup %2277  ;;  %v1264_v51 = vpop.f32.mrf.mxu0 }
 0x37b   :  { %v2280_v57 = vpop.eup %2279  ;;  %1696 = vst [vmem:[%s3721_s14 + $0x18] sm:$0xff] %v2278_v42  ;;  %v1759_v58 = vmul.f32 -1.442695, %v1270_v56  ;;  %v1265_v49 = vadd.f32 %v3577_v7, %v1264_v51 }
 0x37c   :  { %v2282_v37 = vpop.eup %2281  ;;  %v1476_v59 = vadd.f32 1.0, %v2280_v57 }
 0x37d   :  { %v2284_v0 = vpop.eup %2283  ;;  %1695 = vst [vmem:[%s3721_s14 + $0x10] sm:$0xff] %v2282_v37  ;;  %2293 = vpow2.f32 %v1759_v58  ;;  %v1758_v1 = vmul.f32 -1.442695, %v1265_v49 }
 0x37e   :  { %2295 = vrcp.f32 %v1476_v59  ;;  %v1475_v2 = vadd.f32 1.0, %v2284_v0 }
 0x37f   :  { %2297 = vpow2.f32 %v1758_v1 }
 0x380   :  { %2299 = vrcp.f32 %v1475_v2  ;;  %v2136_v3 = vpop.f32.mrf.mxu0 }
 0x381   :  { %v1280_v4 = vadd.f32 %v2136_v3, %v3577_v7 }
 0x382   :  { %v2286_v52 = vpop.eup %2285  ;;  %v1274_v60 = vpop.f32.mrf.mxu0 }
 0x383   :  { %v2288_v61 = vpop.eup %2287  ;;  %v1478_v63 = vadd.f32 1.0, %v2286_v52  ;;  %v1761_v5 = vmul.f32 -1.442695, %v1280_v4  ;;  %v1275_v11 = vadd.f32 %v3577_v7, %v1274_v60 }
 0x384   :  { %v2290_v16 = vpop.eup %2289  ;;  %1698 = vst [vmem:[%s3721_s14 + $0x28] sm:$0xff] %v2288_v61 }
 0x385   :  { %v2292_v39 = vpop.eup %2291  ;;  %2301 = vrcp.f32 %v1478_v63  ;;  %v1477_v13 = vadd.f32 1.0, %v2290_v16  ;;  %v1760_v14 = vmul.f32 -1.442695, %v1275_v11 }
 0x386   :  { %1697 = vst [vmem:[%s3721_s14 + $0x20] sm:$0xff] %v2292_v39  ;;  %2303 = vpow2.f32 %v1761_v5 }
 0x387   :  { %2305 = vrcp.f32 %v1477_v13 }
 0x388   :  { %2307 = vpow2.f32 %v1760_v14  ;;  %v2139_v15 = vpop.f32.mrf.mxu0 }
 0x389   :  { %v1290_v8 = vadd.f32 %v2139_v15, %v3577_v7 }
 0x38a   :  { %v2294_v9 = vpop.eup %2293  ;;  %v1284_v12 = vpop.f32.mrf.mxu0 }
 0x38b   :  { %v2296_v17 = vpop.eup %2295  ;;  %v1480_v19 = vadd.f32 1.0, %v2294_v9  ;;  %v1763_v10 = vmul.f32 -1.442695, %v1290_v8  ;;  %v1285_v6 = vadd.f32 %v3577_v7, %v1284_v12 }
 0x38c   :  { %v2298_v21 = vpop.eup %2297  ;;  %1700 = vst [vmem:[%s3721_s14 + $0x38] sm:$0xff] %v2296_v17 }
 0x38d   :  { %v2300_v23 = vpop.eup %2299  ;;  %2309 = vrcp.f32 %v1480_v19  ;;  %v1479_v25 = vadd.f32 1.0, %v2298_v21  ;;  %v1762_v22 = vmul.f32 -1.442695, %v1285_v6 }
 0x38e   :  { %1699 = vst [vmem:[%s3721_s14 + $0x30] sm:$0xff] %v2300_v23  ;;  %2311 = vpow2.f32 %v1763_v10 }
 0x38f   :  { %2313 = vrcp.f32 %v1479_v25 }
 0x390   :  { %2315 = vpow2.f32 %v1762_v22  ;;  %v2142_v26 = vpop.f32.mrf.mxu0 }
 0x391   :  { %v1300_v27 = vadd.f32 %v2142_v26, %v3577_v7 }
 0x392   :  { %v2302_v20 = vpop.eup %2301  ;;  %v1294_v28 = vpop.f32.mrf.mxu0 }
 0x393   :  { %v2304_v30 = vpop.eup %2303  ;;  %1702 = vst [vmem:[%s3721_s14 + $0x48] sm:$0xff] %v2302_v20  ;;  %v1765_v62 = vmul.f32 -1.442695, %v1300_v27  ;;  %v1295_v29 = vadd.f32 %v3577_v7, %v1294_v28 }
 0x394   :  { %v2306_v32 = vpop.eup %2305  ;;  %v1482_v33 = vadd.f32 1.0, %v2304_v30 }
 0x395   :  { %v2308_v34 = vpop.eup %2307  ;;  %1701 = vst [vmem:[%s3721_s14 + $0x40] sm:$0xff] %v2306_v32  ;;  %2317 = vpow2.f32 %v1765_v62  ;;  %v1764_v36 = vmul.f32 -1.442695, %v1295_v29 }
 0x396   :  { %2319 = vrcp.f32 %v1482_v33  ;;  %v1481_v38 = vadd.f32 1.0, %v2308_v34 }
 0x397   :  { %2321 = vpow2.f32 %v1764_v36 }
 0x398   :  { %2323 = vrcp.f32 %v1481_v38  ;;  %v2145_v31 = vpop.f32.mrf.mxu0 }
 0x399   :  { %v1310_v40 = vadd.f32 %v2145_v31, %v3577_v7 }
 0x39a   :  { %v2310_v18 = vpop.eup %2309  ;;  %v1304_v43 = vpop.f32.mrf.mxu0 }
 0x39b   :  { %v2312_v44 = vpop.eup %2311  ;;  %1704 = vst [vmem:[%s3721_s14 + $0x58] sm:$0xff] %v2310_v18  ;;  %v1767_v35 = vmul.f32 -1.442695, %v1310_v40  ;;  %v1305_v45 = vadd.f32 %v3577_v7, %v1304_v43 }
 0x39c   :  { %v2314_v46 = vpop.eup %2313  ;;  %v1484_v47 = vadd.f32 1.0, %v2312_v44 }
 0x39d   :  { %v2316_v41 = vpop.eup %2315  ;;  %1703 = vst [vmem:[%s3721_s14 + $0x50] sm:$0xff] %v2314_v46  ;;  %2325 = vpow2.f32 %v1767_v35  ;;  %v1766_v48 = vmul.f32 -1.442695, %v1305_v45 }
 0x39e   :  { %2327 = vrcp.f32 %v1484_v47  ;;  %v1483_v50 = vadd.f32 1.0, %v2316_v41 }
 0x39f   :  { %2329 = vpow2.f32 %v1766_v48 }
 0x3a0   :  { %2331 = vrcp.f32 %v1483_v50  ;;  %v2148_v24 = vpop.f32.mrf.mxu0 }
 0x3a1   :  { %v1320_v53 = vadd.f32 %v2148_v24, %v3577_v7 }
 0x3a2   :  { %v2318_v54 = vpop.eup %2317  ;;  %v1314_v55 = vpop.f32.mrf.mxu0 }
 0x3a3   :  { %v2320_v56 = vpop.eup %2319  ;;  %v1486_v42 = vadd.f32 1.0, %v2318_v54  ;;  %v1769_v51 = vmul.f32 -1.442695, %v1320_v53  ;;  %v1315_v57 = vadd.f32 %v3577_v7, %v1314_v55 }
 0x3a4   :  { %v2322_v58 = vpop.eup %2321  ;;  %1706 = vst [vmem:[%s3721_s14 + $0x68] sm:$0xff] %v2320_v56 }
 0x3a5   :  { %v2324_v49 = vpop.eup %2323  ;;  %2333 = vrcp.f32 %v1486_v42  ;;  %v1485_v37 = vadd.f32 1.0, %v2322_v58  ;;  %v1768_v59 = vmul.f32 -1.442695, %v1315_v57 }
 0x3a6   :  { %1705 = vst [vmem:[%s3721_s14 + $0x60] sm:$0xff] %v2324_v49  ;;  %2335 = vpow2.f32 %v1769_v51 }
 0x3a7   :  { %2337 = vrcp.f32 %v1485_v37 }
 0x3a8   :  { %2339 = vpow2.f32 %v1768_v59  ;;  %v2151_v0 = vpop.f32.mrf.mxu0 }
 0x3a9   :  { %v1330_v1 = vadd.f32 %v2151_v0, %v3577_v7 }
 0x3aa   :  { %v2326_v2 = vpop.eup %2325  ;;  %v1324_v3 = vpop.f32.mrf.mxu0 }
 0x3ab   :  { %v2328_v4 = vpop.eup %2327  ;;  %v1488_v52 = vadd.f32 1.0, %v2326_v2  ;;  %v1771_v60 = vmul.f32 -1.442695, %v1330_v1  ;;  %v1325_v61 = vadd.f32 %v3577_v7, %v1324_v3 }
 0x3ac   :  { %v2330_v63 = vpop.eup %2329  ;;  %1708 = vst [vmem:[%s3721_s14 + $0x78] sm:$0xff] %v2328_v4 }
 0x3ad   :  { %v2332_v5 = vpop.eup %2331  ;;  %2341 = vrcp.f32 %v1488_v52  ;;  %v1487_v11 = vadd.f32 1.0, %v2330_v63  ;;  %v1770_v16 = vmul.f32 -1.442695, %v1325_v61 }
 0x3ae   :  { %1707 = vst [vmem:[%s3721_s14 + $0x70] sm:$0xff] %v2332_v5  ;;  %2343 = vpow2.f32 %v1771_v60 }
 0x3af   :  { %2345 = vrcp.f32 %v1487_v11 }
 0x3b0   :  { %2347 = vpow2.f32 %v1770_v16  ;;  %v2154_v39 = vpop.f32.mrf.mxu0 }
 0x3b1   :  { %v1340_v13 = vadd.f32 %v2154_v39, %v3577_v7 }
 0x3b2   :  { %v2334_v14 = vpop.eup %2333  ;;  %v1334_v15 = vpop.f32.mrf.mxu0 }
 0x3b3   :  { %v2336_v8 = vpop.eup %2335  ;;  %1710 = vst [vmem:[%s3721_s14 + $0x88] sm:$0xff] %v2334_v14  ;;  %v1773_v9 = vmul.f32 -1.442695, %v1340_v13  ;;  %v1335_v12 = vadd.f32 %v3577_v7, %v1334_v15 }
 0x3b4   :  { %v2338_v17 = vpop.eup %2337  ;;  %v1490_v19 = vadd.f32 1.0, %v2336_v8 }
 0x3b5   :  { %v2340_v10 = vpop.eup %2339  ;;  %1709 = vst [vmem:[%s3721_s14 + $0x80] sm:$0xff] %v2338_v17  ;;  %2349 = vpow2.f32 %v1773_v9  ;;  %v1772_v6 = vmul.f32 -1.442695, %v1335_v12 }
 0x3b6   :  { %2351 = vrcp.f32 %v1490_v19  ;;  %v1489_v21 = vadd.f32 1.0, %v2340_v10 }
 0x3b7   :  { %2353 = vpow2.f32 %v1772_v6 }
 0x3b8   :  { %2355 = vrcp.f32 %v1489_v21  ;;  %v2157_v23 = vpop.f32.mrf.mxu0 }
 0x3b9   :  { %v1350_v25 = vadd.f32 %v2157_v23, %v3577_v7 }
 0x3ba   :  { %v2342_v22 = vpop.eup %2341  ;;  %v1344_v26 = vpop.f32.mrf.mxu0 }
 0x3bb   :  { %v2344_v27 = vpop.eup %2343  ;;  %1712 = vst [vmem:[%s3721_s14 + $0x98] sm:$0xff] %v2342_v22  ;;  %v1775_v20 = vmul.f32 -1.442695, %v1350_v25  ;;  %v1345_v28 = vadd.f32 %v3577_v7, %v1344_v26 }
 0x3bc   :  { %v2346_v30 = vpop.eup %2345  ;;  %v1492_v62 = vadd.f32 1.0, %v2344_v27 }
 0x3bd   :  { %v2348_v29 = vpop.eup %2347  ;;  %1711 = vst [vmem:[%s3721_s14 + $0x90] sm:$0xff] %v2346_v30  ;;  %2357 = vpow2.f32 %v1775_v20  ;;  %v1774_v32 = vmul.f32 -1.442695, %v1345_v28 }
 0x3be   :  { %2359 = vrcp.f32 %v1492_v62  ;;  %v1491_v33 = vadd.f32 1.0, %v2348_v29 }
 0x3bf   :  { %2361 = vpow2.f32 %v1774_v32 }
 0x3c0   :  { %2363 = vrcp.f32 %v1491_v33  ;;  %v2160_v34 = vpop.f32.mrf.mxu0 }
 0x3c1   :  { %v1360_v36 = vadd.f32 %v2160_v34, %v3577_v7 }
 0x3c2   :  { %v2350_v38 = vpop.eup %2349  ;;  %v1354_v31 = vpop.f32.mrf.mxu0 }
 0x3c3   :  { %v2352_v40 = vpop.eup %2351  ;;  %v1494_v18 = vadd.f32 1.0, %v2350_v38  ;;  %v1777_v43 = vmul.f32 -1.442695, %v1360_v36  ;;  %v1355_v44 = vadd.f32 %v3577_v7, %v1354_v31 }
 0x3c4   :  { %v2354_v35 = vpop.eup %2353  ;;  %1714 = vst [vmem:[%s3721_s14 + $0xa8] sm:$0xff] %v2352_v40 }
 0x3c5   :  { %v2356_v45 = vpop.eup %2355  ;;  %2365 = vrcp.f32 %v1494_v18  ;;  %v1493_v46 = vadd.f32 1.0, %v2354_v35  ;;  %v1776_v47 = vmul.f32 -1.442695, %v1355_v44 }
 0x3c6   :  { %1713 = vst [vmem:[%s3721_s14 + $0xa0] sm:$0xff] %v2356_v45  ;;  %2367 = vpow2.f32 %v1777_v43 }
 0x3c7   :  { %2369 = vrcp.f32 %v1493_v46 }
 0x3c8   :  { %2371 = vpow2.f32 %v1776_v47  ;;  %v2163_v41 = vpop.f32.mrf.mxu0 }
 0x3c9   :  { %v1370_v48 = vadd.f32 %v2163_v41, %v3577_v7 }
 0x3ca   :  { %v2358_v50 = vpop.eup %2357  ;;  %v1364_v24 = vpop.f32.mrf.mxu0 }
 0x3cb   :  { %v2360_v53 = vpop.eup %2359  ;;  %v1496_v54 = vadd.f32 1.0, %v2358_v50  ;;  %v1779_v55 = vmul.f32 -1.442695, %v1370_v48  ;;  %v1365_v56 = vadd.f32 %v3577_v7, %v1364_v24 }
 0x3cc   :  { %v2362_v42 = vpop.eup %2361  ;;  %1716 = vst [vmem:[%s3721_s14 + $0xb8] sm:$0xff] %v2360_v53 }
 0x3cd   :  { %v2364_v51 = vpop.eup %2363  ;;  %2373 = vrcp.f32 %v1496_v54  ;;  %v1495_v57 = vadd.f32 1.0, %v2362_v42  ;;  %v1778_v58 = vmul.f32 -1.442695, %v1365_v56 }
 0x3ce   :  { %1715 = vst [vmem:[%s3721_s14 + $0xb0] sm:$0xff] %v2364_v51  ;;  %2375 = vpow2.f32 %v1779_v55 }
 0x3cf   :  { %2377 = vrcp.f32 %v1495_v57 }
 0x3d0   :  { %2379 = vpow2.f32 %v1778_v58 }
 0x3d2   :  { %v2366_v49 = vpop.eup %2365 }
 0x3d3   :  { %v2368_v37 = vpop.eup %2367  ;;  %1718 = vst [vmem:[%s3721_s14 + $0xc8] sm:$0xff] %v2366_v49 }
 0x3d4   :  { %v2370_v7 = vpop.eup %2369  ;;  %v1498_v59 = vadd.f32 1.0, %v2368_v37 }
 0x3d5   :  { %v2372_v0 = vpop.eup %2371  ;;  %1717 = vst [vmem:[%s3721_s14 + $0xc0] sm:$0xff] %v2370_v7 }
 0x3d6   :  { %2381 = vrcp.f32 %v1498_v59  ;;  %v1497_v1 = vadd.f32 1.0, %v2372_v0 }
 0x3d8   :  { %2383 = vrcp.f32 %v1497_v1 }
 0x3da   :  { %v2374_v2 = vpop.eup %2373 }
 0x3db   :  { %v2376_v3 = vpop.eup %2375  ;;  %1720 = vst [vmem:[%s3721_s14 + $0xd8] sm:$0xff] %v2374_v2 }
 0x3dc   :  { %v2378_v4 = vpop.eup %2377  ;;  %v1500_v52 = vadd.f32 1.0, %v2376_v3 }
 0x3dd   :  { %v2380_v60 = vpop.eup %2379  ;;  %1719 = vst [vmem:[%s3721_s14 + $0xd0] sm:$0xff] %v2378_v4 }
 0x3de   :  { %2385 = vrcp.f32 %v1500_v52  ;;  %v1499_v61 = vadd.f32 1.0, %v2380_v60 }
 0x3e0   :  { %2387 = vrcp.f32 %v1499_v61 }
 0x3e3   :  { %v2382_v63 = vpop.eup %2381 }
 0x3e4   :  { %1722 = vst [vmem:[%s3721_s14 + $0xe8] sm:$0xff] %v2382_v63 }
 0x3e5   :  { %v2384_v5 = vpop.eup %2383 }
 0x3e6   :  { %1721 = vst [vmem:[%s3721_s14 + $0xe0] sm:$0xff] %v2384_v5 }
 0x3eb   :  { %v2386_v11 = vpop.eup %2385 }
 0x3ec   :  { %1724 = vst [vmem:[%s3721_s14 + $0xf8] sm:$0xff] %v2386_v11 }
 0x3ed   :  { %v2388_v16 = vpop.eup %2387 }
 0x3ee   :  { %1723 = vst [vmem:[%s3721_s14 + $0xf0] sm:$0xff] %v2388_v16 }

</bundles_post_ra>
